<compile_context>
chip_gen: v7x
topology: tpu7x:2x2x1
jax: 0.10.0
libtpu: 0.0.40
codegen_flags: <defaults>
</compile_context>

<pallas_src>
import jax
import jax.numpy as jnp
from jax.experimental import pallas as pl
from jax.experimental.pallas import tpu as pltpu

IN_DIM, H1, H2, H3, OUT_DIM = 3, 128, 256, 128, 7
OUT_PAD = 128  # lane-dense padded output width (multiple of 128)


def mlp_kernel(x_ref,
               w1_ref, b1_ref,
               w2_ref, b2_ref,
               w3_ref, b3_ref,
               w4_ref, b4_ref,
               o_ref):
    # Fused 4-layer MLP; all matmuls hit the MXU with f32 accumulation,
    # ReLUs run on the VPU while operands stay resident in VMEM.
    x = x_ref[...]
    h = jnp.dot(x, w1_ref[...], preferred_element_type=jnp.float32) + b1_ref[...]
    h = jnp.maximum(h, 0.0)
    h = jnp.dot(h, w2_ref[...], preferred_element_type=jnp.float32) + b2_ref[...]
    h = jnp.maximum(h, 0.0)
    h = jnp.dot(h, w3_ref[...], preferred_element_type=jnp.float32) + b3_ref[...]
    h = jnp.maximum(h, 0.0)
    # w4/b4 are zero-padded to OUT_PAD lanes -> lane-dense (tb, 128) store.
    h = jnp.dot(h, w4_ref[...], preferred_element_type=jnp.float32) + b4_ref[...]
    o_ref[...] = h.astype(o_ref.dtype)


def imitation_mlp(x, params, *, tb=256):
    """x: (B, 3) float32. params: dict of transposed weights/biases. Returns (B, 7).

    tb: batch tile. Default 256 (multiple of 256 for v6e/v7x MXU granularity, of 128 for
    v5e). B is zero-padded up to a multiple of tb; the output is sliced back to (B, 7).
    """
    B = x.shape[0]
    n_tiles = pl.cdiv(B, tb)
    Bp = n_tiles * tb
    if Bp != B:
        x = jnp.pad(x, ((0, Bp - B), (0, 0)))

    # Lane-dense output: zero-pad fc4 to 128 output lanes (zeros => padded lanes are 0).
    w4p = jnp.pad(params["w4"], ((0, 0), (0, OUT_PAD - OUT_DIM)))
    b4p = jnp.pad(params["b4"], ((0, 0), (0, OUT_PAD - OUT_DIM)))

    def full_spec(shape):
        # Weights/biases are small and grid-invariant; the whole tensor is resident in
        # VMEM for every batch tile (constant index_map -> fetched once).
        return pl.BlockSpec(shape, lambda i: (0,) * len(shape))

    grid_spec = pltpu.PrefetchScalarGridSpec(
        num_scalar_prefetch=0,
        grid=(n_tiles,),
        in_specs=[
            pl.BlockSpec((tb, IN_DIM), lambda i: (i, 0)),   # x tile over batch
            full_spec((IN_DIM, H1)),   full_spec((1, H1)),
            full_spec((H1, H2)),       full_spec((1, H2)),
            full_spec((H2, H3)),       full_spec((1, H3)),
            full_spec((H3, OUT_PAD)),  full_spec((1, OUT_PAD)),
        ],
        out_specs=pl.BlockSpec((tb, OUT_PAD), lambda i: (i, 0)),
    )

    weight_bytes = 4 * (IN_DIM * H1 + H1 + H1 * H2 + H2 + H2 * H3 + H3
                        + H3 * OUT_PAD + OUT_PAD)
    cost = pl.CostEstimate(
        flops=2 * Bp * (IN_DIM * H1 + H1 * H2 + H2 * H3 + H3 * OUT_DIM),
        transcendentals=0,
        bytes_accessed=4 * Bp * (IN_DIM + OUT_PAD) + weight_bytes,
    )

    out = pl.pallas_call(
        mlp_kernel,
        out_shape=jax.ShapeDtypeStruct((Bp, OUT_PAD), jnp.float32),
        grid_spec=grid_spec,
        compiler_params=pltpu.CompilerParams(
            dimension_semantics=("parallel",)),   # shards batch tiles across v7x TCs
        cost_estimate=cost,
    )(x,
      params["w1"], params["b1"],
      params["w2"], params["b2"],
      params["w3"], params["b3"],
      w4p, b4p)

    return out[:B, :OUT_DIM]


def init_params(key):
    """Deterministic init mimicking PyTorch's default Linear init (uniform +/- 1/sqrt(fan_in)).
    Weights are stored as (in_features, out_features) — transposed vs nn.Linear."""
    dims = [(IN_DIM, H1), (H1, H2), (H2, H3), (H3, OUT_DIM)]
    params = {}
    keys = jax.random.split(key, 2 * len(dims))
    for li, (fan_in, fan_out) in enumerate(dims, start=1):
        bound = 1.0 / jnp.sqrt(jnp.float32(fan_in))
        wk, bk = keys[2 * (li - 1)], keys[2 * (li - 1) + 1]
        params[f"w{li}"] = jax.random.uniform(
            wk, (fan_in, fan_out), jnp.float32, -bound, bound)
        params[f"b{li}"] = jax.random.uniform(
            bk, (1, fan_out), jnp.float32, -bound, bound)
    return params


def mlp_reference(x, params):
    h = jnp.maximum(x @ params["w1"] + params["b1"], 0.0)
    h = jnp.maximum(h @ params["w2"] + params["b2"], 0.0)
    h = jnp.maximum(h @ params["w3"] + params["b3"], 0.0)
    return h @ params["w4"] + params["b4"]


if __name__ == "__main__":
    key = jax.random.PRNGKey(0)
    pkey, xkey1, xkey2 = jax.random.split(key, 3)
    params = init_params(pkey)

    # Case 1: small batch, not a multiple of the tile -> exercises wrapper padding/slicing.
    B1 = 37
    x1 = jax.random.normal(xkey1, (B1, IN_DIM), jnp.float32)
    out1 = jax.block_until_ready(imitation_mlp(x1, params))
    ref1 = mlp_reference(x1, params)
    assert out1.shape == (B1, OUT_DIM)
    assert jnp.allclose(out1, ref1, atol=1e-5, rtol=1e-5), "mismatch vs JAX reference (B=37)"

    # Case 2: batch spanning multiple grid steps (>=2 tiles, keeps both v7x TCs busy).
    B2 = 300
    x2 = jax.random.normal(xkey2, (B2, IN_DIM), jnp.float32)
    out2 = jax.block_until_ready(imitation_mlp(x2, params))
    ref2 = mlp_reference(x2, params)
    assert out2.shape == (B2, OUT_DIM)
    assert jnp.allclose(out2, ref2, atol=1e-5, rtol=1e-5), "mismatch vs JAX reference (B=300)"

    print("KERNEL_OK")
</pallas_src>

<mosaic_0001>
module attributes {stable_mosaic.version = 11 : i64} {
  func.func @mlp_kernel(%arg0: i32, %arg1: memref<256x3xf32, #tpu.memory_space<vmem>>, %arg2: memref<3x128xf32, #tpu.memory_space<vmem>>, %arg3: memref<1x128xf32, #tpu.memory_space<vmem>>, %arg4: memref<128x256xf32, #tpu.memory_space<vmem>>, %arg5: memref<1x256xf32, #tpu.memory_space<vmem>>, %arg6: memref<256x128xf32, #tpu.memory_space<vmem>>, %arg7: memref<1x128xf32, #tpu.memory_space<vmem>>, %arg8: memref<128x128xf32, #tpu.memory_space<vmem>>, %arg9: memref<1x128xf32, #tpu.memory_space<vmem>>, %arg10: memref<256x128xf32, #tpu.memory_space<vmem>>) attributes {dimension_semantics = [#tpu.dimension_semantics<parallel>], iteration_bounds = array<i64: 1>, scalar_prefetch = 0 : i64, scratch_operands = 0 : i64, tpu.core_type = #tpu.core_type<tc>, window_params = [{transform_indices = @transform_0, window_bounds = array<i64: 256, 3>}, {pipeline_mode = #tpu.pipeline_mode<synchronous>, transform_indices = @transform_1, window_bounds = array<i64: 3, 128>}, {pipeline_mode = #tpu.pipeline_mode<synchronous>, transform_indices = @transform_2, window_bounds = array<i64: 1, 128>}, {pipeline_mode = #tpu.pipeline_mode<synchronous>, transform_indices = @transform_3, window_bounds = array<i64: 128, 256>}, {pipeline_mode = #tpu.pipeline_mode<synchronous>, transform_indices = @transform_4, window_bounds = array<i64: 1, 256>}, {pipeline_mode = #tpu.pipeline_mode<synchronous>, transform_indices = @transform_5, window_bounds = array<i64: 256, 128>}, {pipeline_mode = #tpu.pipeline_mode<synchronous>, transform_indices = @transform_6, window_bounds = array<i64: 1, 128>}, {pipeline_mode = #tpu.pipeline_mode<synchronous>, transform_indices = @transform_7, window_bounds = array<i64: 128, 128>}, {pipeline_mode = #tpu.pipeline_mode<synchronous>, transform_indices = @transform_8, window_bounds = array<i64: 1, 128>}, {transform_indices = @transform_9, window_bounds = array<i64: 256, 128>}]} {
    %c0 = arith.constant 0 : index
    %c0_0 = arith.constant 0 : index
    %0 = vector.load %arg1[%c0, %c0_0] : memref<256x3xf32, #tpu.memory_space<vmem>>, vector<256x3xf32>
    %c0_1 = arith.constant 0 : index
    %c0_2 = arith.constant 0 : index
    %1 = vector.load %arg2[%c0_1, %c0_2] : memref<3x128xf32, #tpu.memory_space<vmem>>, vector<3x128xf32>
    %cst = arith.constant dense<0.000000e+00> : vector<256x128xf32>
    %2 = tpu.matmul %0, %1, %cst {dimension_numbers = #tpu.dot_dimension_numbers<[1], [0], [0], [1], [0, 0, 1, 1], [], []>} : vector<256x3xf32>, vector<3x128xf32>, vector<256x128xf32> -> vector<256x128xf32>
    %c0_3 = arith.constant 0 : index
    %c0_4 = arith.constant 0 : index
    %3 = vector.load %arg3[%c0_3, %c0_4] : memref<1x128xf32, #tpu.memory_space<vmem>>, vector<1x128xf32>
    %4 = vector.broadcast %3 : vector<1x128xf32> to vector<256x128xf32>
    %5 = arith.addf %2, %4 : vector<256x128xf32>
    %cst_5 = arith.constant 0.000000e+00 : f32
    %6 = vector.broadcast %cst_5 : f32 to vector<256x128xf32>
    %7 = arith.maximumf %5, %6 : vector<256x128xf32>
    %c0_6 = arith.constant 0 : index
    %c0_7 = arith.constant 0 : index
    %8 = vector.load %arg4[%c0_6, %c0_7] : memref<128x256xf32, #tpu.memory_space<vmem>>, vector<128x256xf32>
    %cst_8 = arith.constant dense<0.000000e+00> : vector<256x256xf32>
    %9 = tpu.matmul %7, %8, %cst_8 {dimension_numbers = #tpu.dot_dimension_numbers<[1], [0], [0], [1], [0, 0, 1, 1], [], []>} : vector<256x128xf32>, vector<128x256xf32>, vector<256x256xf32> -> vector<256x256xf32>
    %c0_9 = arith.constant 0 : index
    %c0_10 = arith.constant 0 : index
    %10 = vector.load %arg5[%c0_9, %c0_10] : memref<1x256xf32, #tpu.memory_space<vmem>>, vector<1x256xf32>
    %11 = vector.broadcast %10 : vector<1x256xf32> to vector<256x256xf32>
    %12 = arith.addf %9, %11 : vector<256x256xf32>
    %cst_11 = arith.constant 0.000000e+00 : f32
    %13 = vector.broadcast %cst_11 : f32 to vector<256x256xf32>
    %14 = arith.maximumf %12, %13 : vector<256x256xf32>
    %c0_12 = arith.constant 0 : index
    %c0_13 = arith.constant 0 : index
    %15 = vector.load %arg6[%c0_12, %c0_13] : memref<256x128xf32, #tpu.memory_space<vmem>>, vector<256x128xf32>
    %cst_14 = arith.constant dense<0.000000e+00> : vector<256x128xf32>
    %16 = tpu.matmul %14, %15, %cst_14 {dimension_numbers = #tpu.dot_dimension_numbers<[1], [0], [0], [1], [0, 0, 1, 1], [], []>} : vector<256x256xf32>, vector<256x128xf32>, vector<256x128xf32> -> vector<256x128xf32>
    %c0_15 = arith.constant 0 : index
    %c0_16 = arith.constant 0 : index
    %17 = vector.load %arg7[%c0_15, %c0_16] : memref<1x128xf32, #tpu.memory_space<vmem>>, vector<1x128xf32>
    %18 = vector.broadcast %17 : vector<1x128xf32> to vector<256x128xf32>
    %19 = arith.addf %16, %18 : vector<256x128xf32>
    %cst_17 = arith.constant 0.000000e+00 : f32
    %20 = vector.broadcast %cst_17 : f32 to vector<256x128xf32>
    %21 = arith.maximumf %19, %20 : vector<256x128xf32>
    %c0_18 = arith.constant 0 : index
    %c0_19 = arith.constant 0 : index
    %22 = vector.load %arg8[%c0_18, %c0_19] : memref<128x128xf32, #tpu.memory_space<vmem>>, vector<128x128xf32>
    %cst_20 = arith.constant dense<0.000000e+00> : vector<256x128xf32>
    %23 = tpu.matmul %21, %22, %cst_20 {dimension_numbers = #tpu.dot_dimension_numbers<[1], [0], [0], [1], [0, 0, 1, 1], [], []>} : vector<256x128xf32>, vector<128x128xf32>, vector<256x128xf32> -> vector<256x128xf32>
    %c0_21 = arith.constant 0 : index
    %c0_22 = arith.constant 0 : index
    %24 = vector.load %arg9[%c0_21, %c0_22] : memref<1x128xf32, #tpu.memory_space<vmem>>, vector<1x128xf32>
    %25 = vector.broadcast %24 : vector<1x128xf32> to vector<256x128xf32>
    %26 = arith.addf %23, %25 : vector<256x128xf32>
    %c0_23 = arith.constant 0 : index
    %c0_24 = arith.constant 0 : index
    %27 = vector.load %arg10[%c0_23, %c0_24] : memref<256x128xf32, #tpu.memory_space<vmem>>, vector<256x128xf32>
    tpu.vector_store %arg10[%c0_23, %c0_24], %26 {strides = array<i32>} : memref<256x128xf32, #tpu.memory_space<vmem>>, vector<256x128xf32>,
    return
  }
  func.func @transform_0(%arg0: i32) -> (i32, i32) {
    %c0_i32 = arith.constant 0 : i32
    %c0_i32_0 = arith.constant 0 : i32
    return %arg0, %c0_i32 : i32, i32
  }
  func.func @transform_1(%arg0: i32) -> (i32, i32) {
    %c0_i32 = arith.constant 0 : i32
    %c0_i32_0 = arith.constant 0 : i32
    %c0_i32_1 = arith.constant 0 : i32
    return %c0_i32, %c0_i32_0 : i32, i32
  }
  func.func @transform_2(%arg0: i32) -> (i32, i32) {
    %c0_i32 = arith.constant 0 : i32
    %c0_i32_0 = arith.constant 0 : i32
    %c0_i32_1 = arith.constant 0 : i32
    return %c0_i32, %c0_i32_0 : i32, i32
  }
  func.func @transform_3(%arg0: i32) -> (i32, i32) {
    %c0_i32 = arith.constant 0 : i32
    %c0_i32_0 = arith.constant 0 : i32
    %c0_i32_1 = arith.constant 0 : i32
    return %c0_i32, %c0_i32_0 : i32, i32
  }
  func.func @transform_4(%arg0: i32) -> (i32, i32) {
    %c0_i32 = arith.constant 0 : i32
    %c0_i32_0 = arith.constant 0 : i32
    %c0_i32_1 = arith.constant 0 : i32
    return %c0_i32, %c0_i32_0 : i32, i32
  }
  func.func @transform_5(%arg0: i32) -> (i32, i32) {
    %c0_i32 = arith.constant 0 : i32
    %c0_i32_0 = arith.constant 0 : i32
    %c0_i32_1 = arith.constant 0 : i32
    return %c0_i32, %c0_i32_0 : i32, i32
  }
  func.func @transform_6(%arg0: i32) -> (i32, i32) {
    %c0_i32 = arith.constant 0 : i32
    %c0_i32_0 = arith.constant 0 : i32
    %c0_i32_1 = arith.constant 0 : i32
    return %c0_i32, %c0_i32_0 : i32, i32
  }
  func.func @transform_7(%arg0: i32) -> (i32, i32) {
    %c0_i32 = arith.constant 0 : i32
    %c0_i32_0 = arith.constant 0 : i32
    %c0_i32_1 = arith.constant 0 : i32
    return %c0_i32, %c0_i32_0 : i32, i32
  }
  func.func @transform_8(%arg0: i32) -> (i32, i32) {
    %c0_i32 = arith.constant 0 : i32
    %c0_i32_0 = arith.constant 0 : i32
    %c0_i32_1 = arith.constant 0 : i32
    return %c0_i32, %c0_i32_0 : i32, i32
  }
  func.func @transform_9(%arg0: i32) -> (i32, i32) {
    %c0_i32 = arith.constant 0 : i32
    %c0_i32_0 = arith.constant 0 : i32
    return %arg0, %c0_i32 : i32, i32
  }
}

</mosaic_0001>

<bundles_post_ra>
// kernel: tpu_custom_call.1
= control target key start
LH: loop header
LB: loop body
LE: loop exit
PB: predicated region body
PF: predicated region fallthrough
CT: control target
= control target key end

     0   :  { %14 = vsyncpa [#allocation3], 0  ;;  %s2485_s0 = inlined_call_operand.vmem [shape: f32[256,3], index: 0, kind: input, shape index: {}]   ;;  %s2486_s1 = inlined_call_operand.vmem [shape: f32[3,128], index: 1, kind: input, shape index: {}]   ;;  %s2487_s2 = inlined_call_operand.vmem [shape: f32[1,128], index: 2, kind: input, shape index: {}]   ;;  %s2488_s3 = inlined_call_operand.vmem [shape: f32[128,256], index: 3, kind: input, shape index: {}]   ;;  %s2489_s4 = inlined_call_operand.vmem [shape: f32[1,256], index: 4, kind: input, shape index: {}]   ;;  %s2490_s5 = inlined_call_operand.hbm [shape: f32[256,128], index: 5, kind: input, shape index: {}]   ;;  %s2491_s6 = inlined_call_operand.vmem [shape: f32[1,128], index: 6, kind: input, shape index: {}]   ;;  %s2492_s7 = inlined_call_operand.hbm [shape: f32[128,128], index: 7, kind: input, shape index: {}]   ;;  %s2493_s8 = inlined_call_operand.vmem [shape: f32[1,128], index: 8, kind: input, shape index: {}]   ;;  %s2494_s9 = inlined_call_operand.hbm [shape: f32[256,128], index: 9, kind: output, shape index: {}]  }
   0x1   :  { %15 = vsyncpa [#allocation6], 0 }
   0x2   :  { %16 = vsyncpa [#allocation4], 0  ;;  %s1872_s30 = smov [#allocation2]   ;;  %s1800_s13 = scalar_lea.hbm %s2490_s5, 4096 }
   0x3   :  { %s32_s10 = sshll.u32 %s1872_s30, 4  ;;  %p1801_p0 = scmp.ne.s32.totalorder %s2490_s5, %s1800_s13  ;;  %s33_s10 = int_to_ptr.vmem [resolvable:$true] %s32_s10 }
   0x4   :  { %p1804_p1 = scmp.lt.u32.totalorder %s1800_s13, %s2490_s5 }
   0x6   :  { %p1806_p2 = pnand %p1804_p1, %p1801_p0 }
   0x8   :  { %1809 = shalt.err (!%p1806_p2)
}
   0x9   :  { %s1810_s18 = scalar_lea.vmem %s33_s10, 4096  ;;  %p1815_p4 = scmp.lt.s32.totalorder %s33_s10, %s33_s10 }
   0xa   :  { %p1811_p3 = scmp.ne.s32.totalorder %s33_s10, %s1810_s18  ;;  %p1816_p5 = scmp.lt.s32.totalorder %s1810_s18, %s1810_s18 }
   0xc   :  { %p1817_p6 = por %p1816_p5, %p1815_p4 }
   0xe   :  { %p1818_p7 = pnand %p1817_p6, %p1811_p3 }
  0x10   :  { %1821 = shalt.err (!%p1818_p7)
}
  0x11   :  { %s1873_s19 = smov 128   ;;  %s1874_s20 = smov 8  }
  0x12   :  { %38 = dma.hbm_to_vmem [thread:$0]  %s2490_s5, 4096, %s33_s10, [#allocation3], %s1873_s19, %s1873_s19, %s1874_s20  }
  0x13   :  { %s1875_s23 = smov [#allocation5]   ;;  %s1822_s27 = scalar_lea.hbm %s2492_s7, 2048 }
  0x14   :  { %s46_s24 = sshll.u32 %s1875_s23, 4  ;;  %p1823_p8 = scmp.ne.s32.totalorder %s2492_s7, %s1822_s27  ;;  %s47_s24 = int_to_ptr.vmem [resolvable:$true] %s46_s24 }
  0x15   :  { %p1826_p9 = scmp.lt.u32.totalorder %s1822_s27, %s2492_s7 }
  0x17   :  { %p1828_p10 = pnand %p1826_p9, %p1823_p8 }
  0x19   :  { %1831 = shalt.err (!%p1828_p10)
}
  0x1a   :  { %s1832_s12 = scalar_lea.vmem %s47_s24, 2048  ;;  %p1837_p12 = scmp.lt.s32.totalorder %s47_s24, %s47_s24 }
  0x1b   :  { %p1833_p11 = scmp.ne.s32.totalorder %s47_s24, %s1832_s12  ;;  %p1838_p13 = scmp.lt.s32.totalorder %s1832_s12, %s1832_s12 }
  0x1d   :  { %p1839_p0 = por %p1838_p13, %p1837_p12 }
  0x1f   :  { %p1840_p1 = pnand %p1839_p0, %p1833_p11 }
  0x21   :  { %1843 = shalt.err (!%p1840_p1)
}
  0x22   :  { %52 = dma.hbm_to_vmem [thread:$0]  %s2492_s7, 2048, %s47_s24, [#allocation6], %s1873_s19, %s1873_s19, %s1874_s20  }
  0x23   :  { %1866 = dma.done.wait [#allocation3], 4096  }
  0x24   :  { %1867 = vsyncadd [#allocation3], 4294963200 }
  0x25   :  { %1868 = dma.done.wait [#allocation6], 2048  }
  0x26   :  { %1869 = vsyncadd [#allocation6], 4294965248  ;;  %vm198_vm0 = vcmask 1042432   ;;  %vm101_vm1 = vcmask 23552   ;;  %v93_v0 = vld [vmem:[%s2486_s1] sm:$0x7] }
  0x27   :  { %v61_v1 = vld [vmem:[%s2485_s0] sm:$0xff]  ;;  %v62_v2 = vld [vmem:[%s2485_s0 + $0x8] sm:$0xff]  ;;  %1535 = vmatprep.subr.msk.mxu0 %vm198_vm0, %v93_v0  ;;  %v63_v3 = vld [vmem:[%s2485_s0 + $0x10] sm:$0xff] }
  0x28   :  { %1537 = vmatprep.mubr.msk.f32.mxu0 %vm101_vm1, %v61_v1  ;;  %1536 = vmatpush3.msk.msra.mxu0 %vm198_vm0, %v93_v0  ;;  %v64_v4 = vld [vmem:[%s2485_s0 + $0x18] sm:$0xff]  ;;  %v65_v5 = vld [vmem:[%s2485_s0 + $0x20] sm:$0xff]  ;;  %v66_v6 = vld [vmem:[%s2485_s0 + $0x28] sm:$0xff] }
  0x29   :  { %1538 = vmatmul.mubr.msk.f32.vlgmr.msra.gmra.mrb[0].mxu0 %vm101_vm1, %v62_v2  ;;  %v67_v7 = vld [vmem:[%s2485_s0 + $0x30] sm:$0xff]  ;;  %v68_v8 = vld [vmem:[%s2485_s0 + $0x38] sm:$0xff]  ;;  %v69_v9 = vld [vmem:[%s2485_s0 + $0x40] sm:$0xff] }
  0x2a   :  { %1540 = vmatprep.mubr.msk.f32.mxu0 %vm101_vm1, %v63_v3  ;;  %v460_v10 = vld [vmem:[%s2488_s3 + $0x8] sm:$0xff]  ;;  %v462_v11 = vld [vmem:[%s2488_s3 + $0x18] sm:$0xff]  ;;  %v459_v12 = vld [vmem:[%s2488_s3] sm:$0xff] }
  0x2b   :  { %v1665_v13 = vpack.c.bf16 %v462_v11, %v460_v10  ;;  %v461_v14 = vld [vmem:[%s2488_s3 + $0x10] sm:$0xff]  ;;  %v464_v15 = vld [vmem:[%s2488_s3 + $0x28] sm:$0xff]  ;;  %v466_v16 = vld [vmem:[%s2488_s3 + $0x38] sm:$0xff] }
  0x2c   :  { %v1667_v17 = vpack.c.bf16 %v461_v14, %v459_v12  ;;  %v1669_v18 = vpack.c.bf16 %v466_v16, %v464_v15  ;;  %v463_v19 = vld [vmem:[%s2488_s3 + $0x20] sm:$0xff]  ;;  %v465_v20 = vld [vmem:[%s2488_s3 + $0x30] sm:$0xff]  ;;  %v468_v21 = vld [vmem:[%s2488_s3 + $0x48] sm:$0xff] }
  0x2d   :  { %1541 = vmatmul.mubr.msk.f32.gmra.mrb[2].mxu0 %vm101_vm1, %v64_v4  ;;  %1666 = vmatprep.subr.bf16.mxu1 %v1665_v13  ;;  %v470_v22 = vld [vmem:[%s2488_s3 + $0x58] sm:$0xff]  ;;  %v1671_v23 = vpack.c.bf16 %v465_v20, %v463_v19  ;;  %v70_v24 = vld [vmem:[%s2485_s0 + $0x48] sm:$0xff]  ;;  %v467_v26 = vld [vmem:[%s2488_s3 + $0x40] sm:$0xff] }
  0x2e   :  { %1543 = vmatprep.mubr.msk.f32.mxu0 %vm101_vm1, %v65_v5  ;;  %1668 = vmatpush1.bf16.msra.mxu1 %v1667_v17  ;;  %v1673_v25 = vpack.c.bf16 %v470_v22, %v468_v21  ;;  %v469_v27 = vld [vmem:[%s2488_s3 + $0x50] sm:$0xff]  ;;  %v472_v29 = vld [vmem:[%s2488_s3 + $0x68] sm:$0xff]  ;;  %v474_v30 = vld [vmem:[%s2488_s3 + $0x78] sm:$0xff]  ;;  %v1876_v17 = vmov 0.0  }
  0x2f   :  { %1670 = vmatprep.subr.bf16.mxu1 %v1669_v18  ;;  %v71_v28 = vld [vmem:[%s2485_s0 + $0x50] sm:$0xff]  ;;  %v1675_v31 = vpack.c.bf16 %v469_v27, %v467_v26  ;;  %v72_v32 = vld [vmem:[%s2485_s0 + $0x58] sm:$0xff]  ;;  %v1677_v33 = vpack.c.bf16 %v474_v30, %v472_v29  ;;  %v471_v34 = vld [vmem:[%s2488_s3 + $0x60] sm:$0xff]  ;;  %567 = vmatprep.mubr.f32.mxu1 %v1876_v17 }
  0x30   :  { %v473_v35 = vld [vmem:[%s2488_s3 + $0x70] sm:$0xff]  ;;  %v73_v36 = vld [vmem:[%s2485_s0 + $0x60] sm:$0xff]  ;;  %v476_v37 = vld [vmem:[%s2488_s3 + $0x88] sm:$0xff] }
  0x31   :  { %1544 = vmatmul.mubr.msk.f32.gmra.mrb[4].mxu0 %vm101_vm1, %v66_v6  ;;  %v478_v38 = vld [vmem:[%s2488_s3 + $0x98] sm:$0xff]  ;;  %v1679_v39 = vpack.c.bf16 %v473_v35, %v471_v34  ;;  %v74_v40 = vld [vmem:[%s2485_s0 + $0x68] sm:$0xff]  ;;  %v475_v42 = vld [vmem:[%s2488_s3 + $0x80] sm:$0xff] }
  0x32   :  { %1546 = vmatprep.mubr.msk.f32.mxu0 %vm101_vm1, %v67_v7  ;;  %1672 = vmatpush1.bf16.msra.mxu1 %v1671_v23  ;;  %v1681_v41 = vpack.c.bf16 %v478_v38, %v476_v37  ;;  %v477_v43 = vld [vmem:[%s2488_s3 + $0x90] sm:$0xff]  ;;  %v480_v45 = vld [vmem:[%s2488_s3 + $0xa8] sm:$0xff]  ;;  %v482_v46 = vld [vmem:[%s2488_s3 + $0xb8] sm:$0xff] }
  0x33   :  { %1674 = vmatprep.subr.bf16.mxu1 %v1673_v25  ;;  %v75_v44 = vld [vmem:[%s2485_s0 + $0x70] sm:$0xff]  ;;  %v1683_v47 = vpack.c.bf16 %v477_v43, %v475_v42  ;;  %v76_v48 = vld [vmem:[%s2485_s0 + $0x78] sm:$0xff]  ;;  %v1685_v49 = vpack.c.bf16 %v482_v46, %v480_v45  ;;  %v479_v50 = vld [vmem:[%s2488_s3 + $0xa0] sm:$0xff]  ;;  %v1877_v25 = vmov 0.0|0.0  }
  0x34   :  { %v481_v51 = vld [vmem:[%s2488_s3 + $0xb0] sm:$0xff]  ;;  %v77_v52 = vld [vmem:[%s2485_s0 + $0x80] sm:$0xff]  ;;  %v484_v53 = vld [vmem:[%s2488_s3 + $0xc8] sm:$0xff]  ;;  %1697 = vmatprep.subr.bf16.mxu0 %v1877_v25 }
  0x35   :  { %1547 = vmatmul.mubr.msk.f32.gmra.mrb[6].mxu0 %vm101_vm1, %v68_v8  ;;  %v486_v54 = vld [vmem:[%s2488_s3 + $0xd8] sm:$0xff]  ;;  %v1687_v55 = vpack.c.bf16 %v481_v51, %v479_v50  ;;  %v78_v56 = vld [vmem:[%s2485_s0 + $0x88] sm:$0xff]  ;;  %v483_v58 = vld [vmem:[%s2488_s3 + $0xc0] sm:$0xff] }
  0x36   :  { %1549 = vmatprep.mubr.msk.f32.mxu0 %vm101_vm1, %v69_v9  ;;  %1676 = vmatpush1.bf16.msra.mxu1 %v1675_v31  ;;  %v1689_v57 = vpack.c.bf16 %v486_v54, %v484_v53  ;;  %v485_v59 = vld [vmem:[%s2488_s3 + $0xd0] sm:$0xff]  ;;  %v80_v62 = vld [vmem:[%s2485_s0 + $0x98] sm:$0xff]  ;;  %v81_v63 = vld [vmem:[%s2485_s0 + $0xa0] sm:$0xff] }
  0x37   :  { %1678 = vmatprep.subr.bf16.mxu1 %v1677_v33  ;;  %v79_v60 = vld [vmem:[%s2485_s0 + $0x90] sm:$0xff]  ;;  %v1691_v61 = vpack.c.bf16 %v485_v59, %v483_v58  ;;  %v82_v0 = vld [vmem:[%s2485_s0 + $0xa8] sm:$0xff]  ;;  %v84_v2 = vld [vmem:[%s2485_s0 + $0xb8] sm:$0xff] }
  0x38   :  { %v83_v1 = vld [vmem:[%s2485_s0 + $0xb0] sm:$0xff]  ;;  %v85_v3 = vld [vmem:[%s2485_s0 + $0xc0] sm:$0xff]  ;;  %v86_v4 = vld [vmem:[%s2485_s0 + $0xc8] sm:$0xff] }
  0x39   :  { %1550 = vmatmul.mubr.msk.f32.gmra.mrb[8].mxu0 %vm101_vm1, %v70_v24  ;;  %v87_v5 = vld [vmem:[%s2485_s0 + $0xd0] sm:$0xff]  ;;  %v88_v6 = vld [vmem:[%s2485_s0 + $0xd8] sm:$0xff]  ;;  %v89_v7 = vld [vmem:[%s2485_s0 + $0xe0] sm:$0xff] }
  0x3a   :  { %1552 = vmatprep.mubr.msk.f32.mxu0 %vm101_vm1, %v71_v28  ;;  %1680 = vmatpush1.bf16.msra.mxu1 %v1679_v39  ;;  %v90_v8 = vld [vmem:[%s2485_s0 + $0xe8] sm:$0xff]  ;;  %v91_v9 = vld [vmem:[%s2485_s0 + $0xf0] sm:$0xff]  ;;  %v92_v10 = vld [vmem:[%s2485_s0 + $0xf8] sm:$0xff] }
  0x3b   :  { %1682 = vmatprep.subr.bf16.mxu1 %v1681_v41  ;;  %v488_v11 = vld [vmem:[%s2488_s3 + $0xe8] sm:$0xff]  ;;  %v490_v12 = vld [vmem:[%s2488_s3 + $0xf8] sm:$0xff]  ;;  %v487_v14 = vld [vmem:[%s2488_s3 + $0xe0] sm:$0xff] }
  0x3c   :  { %v1693_v13 = vpack.c.bf16 %v490_v12, %v488_v11  ;;  %v489_v15 = vld [vmem:[%s2488_s3 + $0xf0] sm:$0xff]  ;;  %v2190_v18 = vld [vmem:[%s2487_s2] ss:$0 sm:$0xff]  ;;  %v825_v23 = vld [vmem:[#allocation2 + $0x8] sm:$0xff] }
  0x3d   :  { %1553 = vmatmul.mubr.msk.f32.gmra.mrb[10].mxu0 %vm101_vm1, %v72_v32  ;;  %v1695_v16 = vpack.c.bf16 %v489_v15, %v487_v14  ;;  %v824_v22 = vld [vmem:[#allocation2] sm:$0xff]  ;;  %v826_v24 = vld [vmem:[#allocation2 + $0x10] sm:$0xff]  ;;  %v827_v27 = vld [vmem:[#allocation2 + $0x18] sm:$0xff] }
  0x3e   :  { %1555 = vmatprep.mubr.msk.f32.mxu0 %vm101_vm1, %v73_v36  ;;  %1684 = vmatpush1.bf16.msra.mxu1 %v1683_v47  ;;  %v1698_v26 = vpack.c.bf16 %v825_v23, %v824_v22  ;;  %v1701_v32 = vpack.c.bf16 %v827_v27, %v826_v24  ;;  %v828_v34 = vld [vmem:[#allocation2 + $0x20] sm:$0xff]  ;;  %v829_v35 = vld [vmem:[#allocation2 + $0x28] sm:$0xff]  ;;  %v830_v41 = vld [vmem:[#allocation2 + $0x30] sm:$0xff] }
  0x3f   :  { %1686 = vmatprep.subr.bf16.mxu1 %v1685_v49  ;;  %v1704_v39 = vpack.c.bf16 %v829_v35, %v828_v34  ;;  %v831_v42 = vld [vmem:[#allocation2 + $0x38] sm:$0xff]  ;;  %v833_v49 = vld [vmem:[#allocation2 + $0x48] sm:$0xff]  ;;  %v840_v12 = vld [vmem:[#allocation2 + $0x80] sm:$0xff] }
  0x40   :  { %1699 = vmatpush1.bf16.msra.mxu0 %v1698_v26  ;;  %v1707_v46 = vpack.c.bf16 %v831_v42, %v830_v41  ;;  %v842_v23 = vld [vmem:[#allocation2 + $0x90] sm:$0xff]  ;;  %v843_v24 = vld [vmem:[#allocation2 + $0x98] sm:$0xff]  ;;  %v845_v34 = vld [vmem:[#allocation2 + $0xa8] sm:$0xff] }
  0x41   :  { %1556 = vmatmul.mubr.msk.f32.gmra.mrb[12].mxu0 %vm101_vm1, %v74_v40  ;;  %1700 = vmatprep.subr.bf16.mxu0 %v1877_v25  ;;  %v846_v42 = vld [vmem:[#allocation2 + $0xb0] sm:$0xff] }
  0x42   :  { %1558 = vmatprep.mubr.msk.f32.mxu0 %vm101_vm1, %v75_v44  ;;  %1688 = vmatpush1.bf16.msra.mxu1 %v1687_v55  ;;  %v834_v55 = vld [vmem:[#allocation2 + $0x50] sm:$0xff] }
  0x43   :  { %1690 = vmatprep.subr.bf16.mxu1 %v1689_v57 }
  0x44   :  { %1702 = vmatpush1.bf16.msra.mxu0 %v1701_v32 }
  0x45   :  { %1559 = vmatmul.mubr.msk.f32.gmra.mrb[14].mxu0 %vm101_vm1, %v76_v48  ;;  %1703 = vmatprep.subr.bf16.mxu0 %v1877_v25  ;;  %v832_v48 = vld [vmem:[#allocation2 + $0x40] sm:$0xff] }
  0x46   :  { %1561 = vmatprep.mubr.msk.f32.mxu0 %vm101_vm1, %v77_v52  ;;  %1692 = vmatpush1.bf16.msra.mxu1 %v1691_v61  ;;  %v1710_v53 = vpack.c.bf16 %v833_v49, %v832_v48 }
  0x47   :  { %1694 = vmatprep.subr.bf16.mxu1 %v1693_v13  ;;  %v841_v13 = vld [vmem:[#allocation2 + $0x88] sm:$0xff] }
  0x48   :  { %1705 = vmatpush1.bf16.msra.mxu0 %v1704_v39 }
  0x49   :  { %1562 = vmatmul.mubr.msk.f32.gmra.mrb[16].mxu0 %vm101_vm1, %v78_v56  ;;  %1706 = vmatprep.subr.bf16.mxu0 %v1877_v25  ;;  %v835_v56 = vld [vmem:[#allocation2 + $0x58] sm:$0xff] }
  0x4a   :  { %1564 = vmatprep.mubr.msk.f32.mxu0 %vm101_vm1, %v79_v60  ;;  %1696 = vmatpush1.bf16.msra.mxu1 %v1695_v16  ;;  %v1713_v60 = vpack.c.bf16 %v835_v56, %v834_v55 }
  0x4c   :  { %1708 = vmatpush1.bf16.msra.mxu0 %v1707_v46 }
  0x4d   :  { %1565 = vmatmul.mubr.msk.f32.gmra.mrb[18].mxu0 %vm101_vm1, %v80_v62  ;;  %1709 = vmatprep.subr.bf16.mxu0 %v1877_v25  ;;  %v836_v62 = vld [vmem:[#allocation2 + $0x60] sm:$0xff] }
  0x4e   :  { %1567 = vmatprep.mubr.msk.f32.mxu0 %vm101_vm1, %v81_v63  ;;  %v837_v63 = vld [vmem:[#allocation2 + $0x68] sm:$0xff] }
  0x50   :  { %1711 = vmatpush1.bf16.msra.mxu0 %v1710_v53 }
  0x51   :  { %1568 = vmatmul.mubr.msk.f32.gmra.mrb[20].mxu0 %vm101_vm1, %v82_v0  ;;  %1712 = vmatprep.subr.bf16.mxu0 %v1877_v25 }
  0x52   :  { %1570 = vmatprep.mubr.msk.f32.mxu0 %vm101_vm1, %v83_v1 }
  0x54   :  { %1714 = vmatpush1.bf16.msra.mxu0 %v1713_v60  ;;  %v850_v60 = vld [vmem:[#allocation2 + $0xd0] sm:$0xff] }
  0x55   :  { %1571 = vmatmul.mubr.msk.f32.gmra.mrb[22].mxu0 %vm101_vm1, %v84_v2  ;;  %1715 = vmatprep.subr.bf16.mxu0 %v1877_v25 }
  0x56   :  { %1573 = vmatprep.mubr.msk.f32.mxu0 %vm101_vm1, %v85_v3  ;;  %v1716_v3 = vpack.c.bf16 %v837_v63, %v836_v62 }
  0x58   :  { %1717 = vmatpush1.bf16.msra.mxu0 %v1716_v3 }
  0x59   :  { %1574 = vmatmul.mubr.msk.f32.gmra.mrb[24].mxu0 %vm101_vm1, %v86_v4  ;;  %1718 = vmatprep.subr.bf16.mxu0 %v1877_v25 }
  0x5a   :  { %1576 = vmatprep.mubr.msk.f32.mxu0 %vm101_vm1, %v87_v5  ;;  %v838_v5 = vld [vmem:[#allocation2 + $0x70] sm:$0xff] }
  0x5d   :  { %1577 = vmatmul.mubr.msk.f32.gmra.mrb[26].mxu0 %vm101_vm1, %v88_v6  ;;  %v839_v6 = vld [vmem:[#allocation2 + $0x78] sm:$0xff] }
  0x5e   :  { %1579 = vmatprep.mubr.msk.f32.mxu0 %vm101_vm1, %v89_v7 }
  0x61   :  { %1580 = vmatmul.mubr.msk.f32.gmra.mrb[28].mxu0 %vm101_vm1, %v90_v8 }
  0x62   :  { %1582 = vmatprep.mubr.msk.f32.mxu0 %vm101_vm1, %v91_v9 }
  0x65   :  { %1583 = vmatmul.mubr.msk.f32.gmra.mrb[30].mxu0 %vm101_vm1, %v92_v10  ;;  %v1719_v10 = vpack.c.bf16 %v839_v6, %v838_v5  ;;  %v852_v6 = vld [vmem:[#allocation2 + $0xe0] sm:$0xff] }
  0x67   :  { %1720 = vmatpush1.bf16.msra.mxu0 %v1719_v10 }
  0x68   :  { %1721 = vmatprep.subr.bf16.mxu0 %v1877_v25 }
  0xfc   :  { %v1539_v19 = vpop.f32.mrb[0].mxu0 }
  0xfd   :  { %v268_v20 = vpop.f32.mrb[1].mxu0  ;;  %v274_v28 = vadd.f32 %v1539_v19, %v2190_v18 }
  0xfe   :  { %v269_v21 = vadd.f32 %v2190_v18, %v268_v20  ;;  %v1722_v20 = vpack.c.bf16 %v841_v13, %v840_v12 }
  0xff   :  { %v428_v36 = vmax.f32 %v274_v28, 0.0 }
 0x100   :  { %v427_v29 = vmax.f32 %v269_v21, 0.0  ;;  %v1542_v30 = vpop.f32.mrb[2].mxu0  ;;  %1723 = vmatpush1.bf16.msra.mxu0 %v1722_v20 }
 0x101   :  { %v278_v31 = vpop.f32.mrb[3].mxu0  ;;  %v284_v43 = vadd.f32 %v1542_v30, %v2190_v18  ;;  %v1725_v30 = vpack.c.bf16 %v843_v24, %v842_v23  ;;  %1724 = vmatprep.subr.bf16.mxu0 %v1877_v25 }
 0x102   :  { %568 = vmatmul.mubr.f32.vlgmr.msra.gmra.mrb[0].mxu1 %v427_v29  ;;  %v279_v33 = vadd.f32 %v2190_v18, %v278_v31 }
 0x103   :  { %573 = vmatprep.mubr.f32.mxu1 %v1876_v17  ;;  %v430_v50 = vmax.f32 %v284_v43, 0.0  ;;  %v847_v43 = vld [vmem:[#allocation2 + $0xb8] sm:$0xff] }
 0x104   :  { %v1545_v37 = vpop.f32.mrb[4].mxu0  ;;  %v429_v40 = vmax.f32 %v279_v33, 0.0  ;;  %v844_v33 = vld [vmem:[#allocation2 + $0xa0] sm:$0xff]  ;;  %1726 = vmatpush1.bf16.msra.mxu0 %v1725_v30  ;;  %v1731_v48 = vpack.c.bf16 %v847_v43, %v846_v42  ;;  %v855_v30 = vld [vmem:[#allocation2 + $0xf8] sm:$0xff] }
 0x105   :  { %v288_v38 = vpop.f32.mrb[5].mxu0  ;;  %v294_v57 = vadd.f32 %v1545_v37, %v2190_v18  ;;  %v1728_v39 = vpack.c.bf16 %v845_v34, %v844_v33  ;;  %1727 = vmatprep.subr.bf16.mxu0 %v1877_v25  ;;  %v491_v43 = vld [vmem:[%s2489_s4] sm:$0x3] }
 0x106   :  { %574 = vmatmul.mubr.f32.gmra.mrb[2].mxu1 %v428_v36  ;;  %v289_v47 = vadd.f32 %v2190_v18, %v288_v38 }
 0x107   :  { %579 = vmatprep.mubr.f32.mxu1 %v1876_v17  ;;  %v432_v0 = vmax.f32 %v294_v57, 0.0 }
 0x108   :  { %v1548_v44 = vpop.f32.mrb[6].mxu0  ;;  %v431_v54 = vmax.f32 %v289_v47, 0.0  ;;  %1729 = vmatpush1.bf16.msra.mxu0 %v1728_v39 }
 0x109   :  { %v298_v45 = vpop.f32.mrb[7].mxu0  ;;  %v304_v7 = vadd.f32 %v1548_v44, %v2190_v18  ;;  %1730 = vmatprep.subr.bf16.mxu0 %v1877_v25 }
 0x10a   :  { %580 = vmatmul.mubr.f32.gmra.mrb[4].mxu1 %v429_v40  ;;  %v299_v61 = vadd.f32 %v2190_v18, %v298_v45 }
 0x10b   :  { %585 = vmatprep.mubr.f32.mxu1 %v1876_v17  ;;  %v434_v14 = vmax.f32 %v304_v7, 0.0  ;;  %v853_v7 = vld [vmem:[#allocation2 + $0xe8] sm:$0xff] }
 0x10c   :  { %v1551_v51 = vpop.f32.mrb[8].mxu0  ;;  %v433_v4 = vmax.f32 %v299_v61, 0.0  ;;  %1732 = vmatpush1.bf16.msra.mxu0 %v1731_v48  ;;  %v851_v61 = vld [vmem:[#allocation2 + $0xd8] sm:$0xff]  ;;  %v1740_v13 = vpack.c.bf16 %v853_v7, %v852_v6 }
 0x10d   :  { %v308_v52 = vpop.f32.mrb[9].mxu0  ;;  %v314_v26 = vadd.f32 %v1551_v51, %v2190_v18  ;;  %v848_v51 = vld [vmem:[#allocation2 + $0xc0] sm:$0xff]  ;;  %1733 = vmatprep.subr.bf16.mxu0 %v1877_v25  ;;  %v1737_v3 = vpack.c.bf16 %v851_v61, %v850_v60 }
 0x10e   :  { %586 = vmatmul.mubr.f32.gmra.mrb[6].mxu1 %v430_v50  ;;  %v309_v11 = vadd.f32 %v2190_v18, %v308_v52  ;;  %v849_v52 = vld [vmem:[#allocation2 + $0xc8] sm:$0xff] }
 0x10f   :  { %591 = vmatprep.mubr.f32.mxu1 %v1876_v17  ;;  %v436_v35 = vmax.f32 %v314_v26, 0.0  ;;  %v1734_v57 = vpack.c.bf16 %v849_v52, %v848_v51  ;;  %v1121_v51 = vld [vmem:[#allocation5 + $0x8] sm:$0xff]  ;;  %v1122_v52 = vld [vmem:[#allocation5 + $0x10] sm:$0xff] }
 0x110   :  { %v2207_v58 = vpop.f32.mrb[10].mxu0  ;;  %v435_v21 = vmax.f32 %v309_v11, 0.0 }
 0x111   :  { %v318_v59 = vpop.f32.mrb[11].mxu0  ;;  %v324_v44 = vadd.f32 %v2207_v58, %v2190_v18  ;;  %1735 = vmatpush1.bf16.msra.mxu0 %v1734_v57 }
 0x112   :  { %592 = vmatmul.mubr.f32.gmra.mrb[8].mxu1 %v431_v54  ;;  %v319_v31 = vadd.f32 %v2190_v18, %v318_v59  ;;  %1736 = vmatprep.subr.bf16.mxu0 %v1877_v25 }
 0x113   :  { %597 = vmatprep.mubr.f32.mxu1 %v1876_v17  ;;  %v438_v53 = vmax.f32 %v324_v44, 0.0 }
 0x114   :  { %v2212_v1 = vpop.f32.mrb[12].mxu0  ;;  %v437_v40 = vmax.f32 %v319_v31, 0.0 }
 0x115   :  { %v2214_v2 = vpop.f32.mrb[13].mxu0  ;;  %v334_v62 = vadd.f32 %v2212_v1, %v2190_v18  ;;  %1738 = vmatpush1.bf16.msra.mxu0 %v1737_v3 }
 0x116   :  { %598 = vmatmul.mubr.f32.gmra.mrb[10].mxu1 %v432_v0  ;;  %v329_v49 = vadd.f32 %v2190_v18, %v2214_v2  ;;  %1739 = vmatprep.subr.bf16.mxu0 %v1877_v25 }
 0x117   :  { %603 = vmatprep.mubr.f32.mxu1 %v1876_v17  ;;  %v440_v1 = vmax.f32 %v334_v62, 0.0  ;;  %v1124_v62 = vld [vmem:[#allocation5 + $0x20] sm:$0xff] }
 0x118   :  { %v2219_v8 = vpop.f32.mrb[14].mxu0  ;;  %v439_v58 = vmax.f32 %v329_v49, 0.0 }
 0x119   :  { %v2221_v9 = vpop.f32.mrb[15].mxu0  ;;  %1741 = vmatpush1.bf16.msra.mxu0 %v1740_v13 }
 0x11a   :  { %604 = vmatmul.mubr.f32.gmra.mrb[12].mxu1 %v433_v4  ;;  %v339_v4 = vadd.f32 %v2190_v18, %v2221_v9  ;;  %1742 = vmatprep.subr.bf16.mxu0 %v1877_v25 }
 0x11b   :  { %609 = vmatprep.mubr.f32.mxu1 %v1876_v17 }
 0x11c   :  { %v1563_v15 = vpop.f32.mrb[16].mxu0 }
 0x11d   :  { %v2227_v16 = vadd.f32 %v1563_v15, %v2190_v18  ;;  %v348_v19 = vpop.f32.mrb[17].mxu0  ;;  %v344_v15 = vadd.f32 %v2219_v8, %v2190_v18 }
 0x11e   :  { %610 = vmatmul.mubr.f32.gmra.mrb[14].mxu1 %v434_v14  ;;  %v2230_v22 = vadd.f32 %v2190_v18, %v348_v19  ;;  %v441_v14 = vmax.f32 %v339_v4, 0.0 }
 0x11f   :  { %615 = vmatprep.mubr.f32.mxu1 %v1876_v17  ;;  %v442_v24 = vmax.f32 %v344_v15, 0.0  ;;  %v444_v8 = vmax.f32 %v2227_v16, 0.0 }
 0x120   :  { %v1566_v27 = vpop.f32.mrb[18].mxu0  ;;  %v443_v26 = vmax.f32 %v2230_v22, 0.0 }
 0x121   :  { %v2236_v28 = vadd.f32 %v1566_v27, %v2190_v18  ;;  %v358_v29 = vpop.f32.mrb[19].mxu0 }
 0x122   :  { %616 = vmatmul.mubr.f32.gmra.mrb[16].mxu1 %v435_v21  ;;  %v2240_v32 = vadd.f32 %v2190_v18, %v358_v29  ;;  %v854_v29 = vld [vmem:[#allocation2 + $0xf0] sm:$0xff] }
 0x123   :  { %621 = vmatprep.mubr.f32.mxu1 %v1876_v17  ;;  %v1743_v31 = vpack.c.bf16 %v855_v30, %v854_v29 }
 0x124   :  { %v1569_v36 = vpop.f32.mrb[20].mxu0  ;;  %v445_v27 = vmax.f32 %v2240_v32, 0.0 }
 0x125   :  { %v2245_v37 = vadd.f32 %v1569_v36, %v2190_v18  ;;  %v368_v38 = vpop.f32.mrb[21].mxu0  ;;  %1744 = vmatpush1.bf16.msra.mxu0 %v1743_v31 }
 0x126   :  { %622 = vmatmul.mubr.f32.gmra.mrb[18].mxu1 %v436_v35  ;;  %v2248_v41 = vadd.f32 %v2190_v18, %v368_v38 }
 0x127   :  { %627 = vmatprep.mubr.f32.mxu1 %v1876_v17  ;;  %v448_v16 = vmax.f32 %v2245_v37, 0.0 }
 0x128   :  { %v1572_v45 = vpop.f32.mrb[22].mxu0  ;;  %v447_v25 = vmax.f32 %v2248_v41, 0.0 }
 0x129   :  { %v2255_v46 = vadd.f32 %v1572_v45, %v2190_v18  ;;  %v378_v47 = vpop.f32.mrb[23].mxu0 }
 0x12a   :  { %628 = vmatmul.mubr.f32.gmra.mrb[20].mxu1 %v437_v40  ;;  %v2260_v50 = vadd.f32 %v2190_v18, %v378_v47  ;;  %v493_v40 = vlaneseq }
 0x12b   :  { %633 = vmatprep.mubr.f32.mxu1 %v1876_v17 }
 0x12c   :  { %v1575_v54 = vpop.f32.mrb[24].mxu0  ;;  %v449_v22 = vmax.f32 %v2260_v50, 0.0  ;;  %v494_v41 = vshrl.u32 %v493_v40, 7  ;;  %v1120_v50 = vld [vmem:[#allocation5] sm:$0xff] }
 0x12d   :  { %v2265_v55 = vadd.f32 %v1575_v54, %v2190_v18  ;;  %v388_v56 = vpop.f32.mrb[25].mxu0 }
 0x12e   :  { %634 = vmatmul.mubr.f32.gmra.mrb[22].mxu1 %v438_v53  ;;  %v2268_v59 = vadd.f32 %v2190_v18, %v388_v56  ;;  %v495_v42 = vsub.s32 0, %v494_v41  ;;  %v499_v44 = vsub.s32 1, %v494_v41  ;;  %v1123_v56 = vld [vmem:[#allocation5 + $0x18] sm:$0xff] }
 0x12f   :  { %639 = vmatprep.mubr.f32.mxu1 %v1876_v17  ;;  %v452_v33 = vmax.f32 %v2265_v55, 0.0  ;;  %v1745_v55 = vpack.c.bf16 %v1121_v51, %v1120_v50  ;;  %v1749_v61 = vpack.c.bf16 %v1123_v56, %v1122_v52 }
 0x130   :  { %v1578_v63 = vpop.f32.mrb[26].mxu0  ;;  %v451_v32 = vmax.f32 %v2268_v59, 0.0  ;;  %v2328_v45 = vrot.slane %v491_v43, %v495_v42 }
 0x131   :  { %v2275_v0 = vadd.f32 %v1578_v63, %v2190_v18  ;;  %v398_v2 = vpop.f32.mrb[27].mxu0  ;;  %1777 = vmatprep.subr.bf16.mxu1 %v1745_v55  ;;  %v1125_v63 = vld [vmem:[#allocation5 + $0x28] sm:$0xff]  ;;  %1746 = vmatprep.subr.bf16.mxu0 %v1745_v55 }
 0x132   :  { %640 = vmatmul.mubr.f32.gmra.mrb[24].mxu1 %v439_v58  ;;  %v2280_v5 = vadd.f32 %v2190_v18, %v398_v2  ;;  %v1753_v7 = vpack.c.bf16 %v1125_v63, %v1124_v62 }
 0x133   :  { %645 = vmatprep.mubr.f32.mxu1 %v1876_v17  ;;  %v454_v35 = vmax.f32 %v2275_v0, 0.0  ;;  %1785 = vmatpush3.bf16.msra.mxu1 %v1745_v55 }
 0x134   :  { %v1581_v10 = vpop.f32.mrb[28].mxu0  ;;  %v453_v34 = vmax.f32 %v2280_v5, 0.0  ;;  %1778 = vmatprep.subr.bf16.mxu1 %v1749_v61 }
 0x135   :  { %v2285_v11 = vadd.f32 %v1581_v10, %v2190_v18  ;;  %v408_v12 = vpop.f32.mrb[29].mxu0  ;;  %v1127_v10 = vld [vmem:[#allocation5 + $0x38] sm:$0xff] }
 0x136   :  { %646 = vmatmul.mubr.f32.gmra.mrb[26].mxu1 %v440_v1  ;;  %v409_v9 = vadd.f32 %v2190_v18, %v408_v12  ;;  %v1126_v1 = vld [vmem:[#allocation5 + $0x30] sm:$0xff] }
 0x137   :  { %651 = vmatprep.mubr.f32.mxu1 %v1876_v17  ;;  %v456_v37 = vmax.f32 %v2285_v11, 0.0  ;;  %1786 = vmatpush3.bf16.msra.mxu1 %v1749_v61 }
 0x138   :  { %v1584_v19 = vpop.f32.mrb[30].mxu0  ;;  %v455_v36 = vmax.f32 %v409_v9, 0.0  ;;  %1779 = vmatprep.subr.bf16.mxu1 %v1753_v7 }
 0x139   :  { %v424_v20 = vadd.f32 %v1584_v19, %v2190_v18  ;;  %v418_v21 = vpop.f32.mrb[31].mxu0  ;;  %v1757_v19 = vpack.c.bf16 %v1127_v10, %v1126_v1 }
 0x13a   :  { %652 = vmatmul.mubr.f32.gmra.mrb[28].mxu1 %v441_v14  ;;  %v419_v23 = vadd.f32 %v2190_v18, %v418_v21  ;;  %v446_v18 = vmax.f32 %v2236_v28, 0.0  ;;  %v450_v28 = vmax.f32 %v2255_v46, 0.0  ;;  %v2330_v46 = vrot.slane %v491_v43, %v499_v44  ;;  %v1129_v21 = vld [vmem:[#allocation5 + $0x48] sm:$0xff] }
 0x13b   :  { %657 = vmatprep.mubr.f32.mxu1 %v1876_v17  ;;  %v458_v39 = vmax.f32 %v424_v20, 0.0  ;;  %1787 = vmatpush3.bf16.msra.mxu1 %v1753_v7  ;;  %v1128_v20 = vld [vmem:[#allocation5 + $0x40] sm:$0xff] }
 0x13c   :  { %v457_v38 = vmax.f32 %v419_v23, 0.0  ;;  %1780 = vmatprep.subr.bf16.mxu1 %v1757_v19 }
 0x13e   :  { %658 = vmatmul.mubr.f32.gmra.mrb[30].mxu1 %v442_v24 }
 0x13f   :  { %663 = vmatprep.mubr.f32.mxu1 %v1876_v17  ;;  %1788 = vmatpush3.bf16.msra.mxu1 %v1757_v19 }
 0x142   :  { %664 = vmatmul.mubr.f32.gmra.mrb[32].mxu1 %v443_v26 }
 0x143   :  { %669 = vmatprep.mubr.f32.mxu1 %v1876_v17 }
 0x146   :  { %670 = vmatmul.mubr.f32.gmra.mrb[34].mxu1 %v444_v8 }
 0x147   :  { %675 = vmatprep.mubr.f32.mxu1 %v1876_v17 }
 0x14a   :  { %676 = vmatmul.mubr.f32.gmra.mrb[36].mxu1 %v445_v27 }
 0x14b   :  { %681 = vmatprep.mubr.f32.mxu1 %v1876_v17 }
 0x14e   :  { %682 = vmatmul.mubr.f32.gmra.mrb[38].mxu1 %v446_v18 }
 0x14f   :  { %687 = vmatprep.mubr.f32.mxu1 %v1876_v17 }
 0x152   :  { %688 = vmatmul.mubr.f32.gmra.mrb[40].mxu1 %v447_v25  ;;  %v1761_v25 = vpack.c.bf16 %v1129_v21, %v1128_v20 }
 0x153   :  { %693 = vmatprep.mubr.f32.mxu1 %v1876_v17 }
 0x154   :  { %1781 = vmatprep.subr.bf16.mxu1 %v1761_v25 }
 0x155   :  { %1789 = vmatpush3.bf16.msra.mxu1 %v1761_v25 }
 0x156   :  { %694 = vmatmul.mubr.f32.gmra.mrb[42].mxu1 %v448_v16  ;;  %v1130_v16 = vld [vmem:[#allocation5 + $0x50] sm:$0xff] }
 0x157   :  { %699 = vmatprep.mubr.f32.mxu1 %v1876_v17 }
 0x15a   :  { %700 = vmatmul.mubr.f32.gmra.mrb[44].mxu1 %v449_v22  ;;  %v1131_v22 = vld [vmem:[#allocation5 + $0x58] sm:$0xff] }
 0x15b   :  { %705 = vmatprep.mubr.f32.mxu1 %v1876_v17 }
 0x15e   :  { %706 = vmatmul.mubr.f32.gmra.mrb[46].mxu1 %v450_v28 }
 0x15f   :  { %711 = vmatprep.mubr.f32.mxu1 %v1876_v17 }
 0x162   :  { %712 = vmatmul.mubr.f32.gmra.mrb[48].mxu1 %v451_v32 }
 0x163   :  { %717 = vmatprep.mubr.f32.mxu1 %v1876_v17 }
 0x166   :  { %718 = vmatmul.mubr.f32.gmra.mrb[50].mxu1 %v452_v33 }
 0x167   :  { %723 = vmatprep.mubr.f32.mxu1 %v1876_v17 }
 0x16a   :  { %724 = vmatmul.mubr.f32.gmra.mrb[52].mxu1 %v453_v34  ;;  %v1765_v34 = vpack.c.bf16 %v1131_v22, %v1130_v16 }
 0x16b   :  { %729 = vmatprep.mubr.f32.mxu1 %v1876_v17 }
 0x16c   :  { %1782 = vmatprep.subr.bf16.mxu1 %v1765_v34 }
 0x16d   :  { %1790 = vmatpush3.bf16.msra.mxu1 %v1765_v34 }
 0x16e   :  { %730 = vmatmul.mubr.f32.gmra.mrb[54].mxu1 %v454_v35 }
 0x16f   :  { %735 = vmatprep.mubr.f32.mxu1 %v1876_v17 }
 0x172   :  { %736 = vmatmul.mubr.f32.gmra.mrb[56].mxu1 %v455_v36 }
 0x173   :  { %741 = vmatprep.mubr.f32.mxu1 %v1876_v17 }
 0x176   :  { %742 = vmatmul.mubr.f32.gmra.mrb[58].mxu1 %v456_v37 }
 0x177   :  { %747 = vmatprep.mubr.f32.mxu1 %v1876_v17 }
 0x17a   :  { %748 = vmatmul.mubr.f32.gmra.mrb[60].mxu1 %v457_v38 }
 0x17b   :  { %753 = vmatprep.mubr.f32.mxu1 %v1876_v17 }
 0x17e   :  { %754 = vmatmul.mubr.f32.gmra.mrb[62].mxu1 %v458_v39 }
 0x1d5   :  { %v569_v47 = vpop.f32.mrb[0].mxu1 }
 0x1d6   :  { %v570_v48 = vadd.f32 %v569_v47, %v2328_v45  ;;  %v571_v49 = vpop.f32.mrb[1].mxu1 }
 0x1d7   :  { %v572_v17 = vadd.f32 %v571_v49, %v2330_v46 }
 0x1d8   :  { %v760_v57 = vmax.f32 %v570_v48, 0.0 }
 0x1d9   :  { %v761_v53 = vmax.f32 %v572_v17, 0.0  ;;  %v575_v54 = vpop.f32.mrb[2].mxu1 }
 0x1da   :  { %v576_v58 = vadd.f32 %v575_v54, %v2328_v45  ;;  %v577_v59 = vpop.f32.mrb[3].mxu1 }
 0x1db   :  { %v578_v60 = vadd.f32 %v577_v59, %v2330_v46  ;;  %927 = vmatprep.mubr.f32.mxu0 %v761_v53 }
 0x1dc   :  { %928 = vmatmul.mubr.f32.vlgmr.msra.gmra.mrb[32].mxu0 %v760_v57  ;;  %v762_v3 = vmax.f32 %v576_v58, 0.0 }
 0x1dd   :  { %v763_v0 = vmax.f32 %v578_v60, 0.0  ;;  %v581_v2 = vpop.f32.mrb[4].mxu1  ;;  %1748 = vmatpush3.bf16.msra.mxu0 %v1745_v55 }
 0x1de   :  { %v582_v4 = vadd.f32 %v581_v2, %v2328_v45  ;;  %v583_v5 = vpop.f32.mrb[5].mxu1  ;;  %1750 = vmatprep.subr.bf16.mxu0 %v1749_v61 }
 0x1df   :  { %v584_v6 = vadd.f32 %v583_v5, %v2330_v46  ;;  %932 = vmatprep.mubr.f32.mxu0 %v763_v0 }
 0x1e0   :  { %933 = vmatmul.mubr.f32.gmra.mrb[34].mxu0 %v762_v3  ;;  %v764_v13 = vmax.f32 %v582_v4, 0.0 }
 0x1e1   :  { %v765_v11 = vmax.f32 %v584_v6, 0.0  ;;  %v587_v12 = vpop.f32.mrb[6].mxu1  ;;  %1752 = vmatpush3.bf16.msra.mxu0 %v1749_v61 }
 0x1e2   :  { %v588_v14 = vadd.f32 %v587_v12, %v2328_v45  ;;  %v589_v9 = vpop.f32.mrb[7].mxu1  ;;  %1754 = vmatprep.subr.bf16.mxu0 %v1753_v7 }
 0x1e3   :  { %v590_v15 = vadd.f32 %v589_v9, %v2330_v46  ;;  %937 = vmatprep.mubr.f32.mxu0 %v765_v11 }
 0x1e4   :  { %938 = vmatmul.mubr.f32.gmra.mrb[36].mxu0 %v764_v13  ;;  %v766_v26 = vmax.f32 %v588_v14, 0.0 }
 0x1e5   :  { %v767_v23 = vmax.f32 %v590_v15, 0.0  ;;  %v593_v24 = vpop.f32.mrb[8].mxu1  ;;  %1756 = vmatpush3.bf16.msra.mxu0 %v1753_v7 }
 0x1e6   :  { %v594_v8 = vadd.f32 %v593_v24, %v2328_v45  ;;  %v595_v27 = vpop.f32.mrb[9].mxu1  ;;  %1758 = vmatprep.subr.bf16.mxu0 %v1757_v19 }
 0x1e7   :  { %v596_v18 = vadd.f32 %v595_v27, %v2330_v46  ;;  %942 = vmatprep.mubr.f32.mxu0 %v767_v23 }
 0x1e8   :  { %943 = vmatmul.mubr.f32.gmra.mrb[38].mxu0 %v766_v26  ;;  %v768_v31 = vmax.f32 %v594_v8, 0.0 }
 0x1e9   :  { %v769_v29 = vmax.f32 %v596_v18, 0.0  ;;  %v599_v30 = vpop.f32.mrb[10].mxu1  ;;  %1760 = vmatpush3.bf16.msra.mxu0 %v1757_v19 }
 0x1ea   :  { %v600_v28 = vadd.f32 %v599_v30, %v2328_v45  ;;  %v601_v32 = vpop.f32.mrb[11].mxu1  ;;  %1762 = vmatprep.subr.bf16.mxu0 %v1761_v25 }
 0x1eb   :  { %v602_v33 = vadd.f32 %v601_v32, %v2330_v46  ;;  %947 = vmatprep.mubr.f32.mxu0 %v769_v29 }
 0x1ec   :  { %948 = vmatmul.mubr.f32.gmra.mrb[40].mxu0 %v768_v31  ;;  %v770_v37 = vmax.f32 %v600_v28, 0.0 }
 0x1ed   :  { %v771_v35 = vmax.f32 %v602_v33, 0.0  ;;  %v605_v36 = vpop.f32.mrb[12].mxu1  ;;  %1764 = vmatpush3.bf16.msra.mxu0 %v1761_v25 }
 0x1ee   :  { %v606_v38 = vadd.f32 %v605_v36, %v2328_v45  ;;  %v607_v39 = vpop.f32.mrb[13].mxu1  ;;  %1766 = vmatprep.subr.bf16.mxu0 %v1765_v34 }
 0x1ef   :  { %v608_v40 = vadd.f32 %v607_v39, %v2330_v46  ;;  %952 = vmatprep.mubr.f32.mxu0 %v771_v35 }
 0x1f0   :  { %953 = vmatmul.mubr.f32.gmra.mrb[42].mxu0 %v770_v37  ;;  %v772_v43 = vmax.f32 %v606_v38, 0.0 }
 0x1f1   :  { %v773_v41 = vmax.f32 %v608_v40, 0.0  ;;  %v611_v42 = vpop.f32.mrb[14].mxu1  ;;  %1768 = vmatpush3.bf16.msra.mxu0 %v1765_v34 }
 0x1f2   :  { %v612_v44 = vadd.f32 %v611_v42, %v2328_v45  ;;  %v613_v47 = vpop.f32.mrb[15].mxu1 }
 0x1f3   :  { %v614_v48 = vadd.f32 %v613_v47, %v2330_v46  ;;  %957 = vmatprep.mubr.f32.mxu0 %v773_v41 }
 0x1f4   :  { %958 = vmatmul.mubr.f32.gmra.mrb[44].mxu0 %v772_v43  ;;  %v774_v50 = vmax.f32 %v612_v44, 0.0 }
 0x1f5   :  { %v775_v49 = vmax.f32 %v614_v48, 0.0  ;;  %v617_v17 = vpop.f32.mrb[16].mxu1 }
 0x1f6   :  { %v618_v51 = vadd.f32 %v617_v17, %v2328_v45  ;;  %v619_v52 = vpop.f32.mrb[17].mxu1 }
 0x1f7   :  { %v620_v53 = vadd.f32 %v619_v52, %v2330_v46  ;;  %962 = vmatprep.mubr.f32.mxu0 %v775_v49 }
 0x1f8   :  { %963 = vmatmul.mubr.f32.gmra.mrb[46].mxu0 %v774_v50  ;;  %v776_v56 = vmax.f32 %v618_v51, 0.0 }
 0x1f9   :  { %v777_v54 = vmax.f32 %v620_v53, 0.0  ;;  %v623_v55 = vpop.f32.mrb[18].mxu1 }
 0x1fa   :  { %v624_v57 = vadd.f32 %v623_v55, %v2328_v45  ;;  %v625_v58 = vpop.f32.mrb[19].mxu1 }
 0x1fb   :  { %v626_v59 = vadd.f32 %v625_v58, %v2330_v46  ;;  %967 = vmatprep.mubr.f32.mxu0 %v777_v54 }
 0x1fc   :  { %968 = vmatmul.mubr.f32.gmra.mrb[48].mxu0 %v776_v56  ;;  %v778_v62 = vmax.f32 %v624_v57, 0.0 }
 0x1fd   :  { %v779_v60 = vmax.f32 %v626_v59, 0.0  ;;  %v629_v61 = vpop.f32.mrb[20].mxu1 }
 0x1fe   :  { %v630_v63 = vadd.f32 %v629_v61, %v2328_v45  ;;  %v631_v0 = vpop.f32.mrb[21].mxu1 }
 0x1ff   :  { %v632_v2 = vadd.f32 %v631_v0, %v2330_v46  ;;  %972 = vmatprep.mubr.f32.mxu0 %v779_v60 }
 0x200   :  { %973 = vmatmul.mubr.f32.gmra.mrb[50].mxu0 %v778_v62  ;;  %v780_v5 = vmax.f32 %v630_v63, 0.0 }
 0x201   :  { %v781_v3 = vmax.f32 %v632_v2, 0.0  ;;  %v635_v4 = vpop.f32.mrb[22].mxu1 }
 0x202   :  { %v636_v6 = vadd.f32 %v635_v4, %v2328_v45  ;;  %v637_v7 = vpop.f32.mrb[23].mxu1 }
 0x203   :  { %v638_v1 = vadd.f32 %v637_v7, %v2330_v46  ;;  %977 = vmatprep.mubr.f32.mxu0 %v781_v3 }
 0x204   :  { %978 = vmatmul.mubr.f32.gmra.mrb[52].mxu0 %v780_v5  ;;  %v782_v12 = vmax.f32 %v636_v6, 0.0 }
 0x205   :  { %v783_v10 = vmax.f32 %v638_v1, 0.0  ;;  %v641_v11 = vpop.f32.mrb[24].mxu1 }
 0x206   :  { %v642_v13 = vadd.f32 %v641_v11, %v2328_v45  ;;  %v643_v14 = vpop.f32.mrb[25].mxu1  ;;  %v1133_v11 = vld [vmem:[#allocation5 + $0x68] sm:$0xff] }
 0x207   :  { %v644_v9 = vadd.f32 %v643_v14, %v2330_v46  ;;  %982 = vmatprep.mubr.f32.mxu0 %v783_v10  ;;  %v1132_v10 = vld [vmem:[#allocation5 + $0x60] sm:$0xff] }
 0x208   :  { %983 = vmatmul.mubr.f32.gmra.mrb[54].mxu0 %v782_v12  ;;  %v784_v20 = vmax.f32 %v642_v13, 0.0 }
 0x209   :  { %v785_v15 = vmax.f32 %v644_v9, 0.0  ;;  %v647_v19 = vpop.f32.mrb[26].mxu1  ;;  %v1769_v9 = vpack.c.bf16 %v1133_v11, %v1132_v10 }
 0x20a   :  { %v648_v21 = vadd.f32 %v647_v19, %v2328_v45  ;;  %v649_v23 = vpop.f32.mrb[27].mxu1 }
 0x20b   :  { %v650_v24 = vadd.f32 %v649_v23, %v2330_v46  ;;  %987 = vmatprep.mubr.f32.mxu0 %v785_v15  ;;  %1770 = vmatprep.subr.bf16.mxu0 %v1769_v9  ;;  %v1135_v23 = vld [vmem:[#allocation5 + $0x78] sm:$0xff] }
 0x20c   :  { %988 = vmatmul.mubr.f32.gmra.mrb[56].mxu0 %v784_v20  ;;  %v786_v27 = vmax.f32 %v648_v21, 0.0  ;;  %v1134_v21 = vld [vmem:[#allocation5 + $0x70] sm:$0xff]  ;;  %1783 = vmatprep.subr.bf16.mxu1 %v1769_v9 }
 0x20d   :  { %v787_v26 = vmax.f32 %v650_v24, 0.0  ;;  %v653_v8 = vpop.f32.mrb[28].mxu1  ;;  %1772 = vmatpush3.bf16.msra.mxu0 %v1769_v9  ;;  %1791 = vmatpush3.bf16.msra.mxu1 %v1769_v9 }
 0x20e   :  { %v654_v18 = vadd.f32 %v653_v8, %v2328_v45  ;;  %v655_v25 = vpop.f32.mrb[29].mxu1 }
 0x20f   :  { %v656_v16 = vadd.f32 %v655_v25, %v2330_v46  ;;  %992 = vmatprep.mubr.f32.mxu0 %v787_v26 }
 0x210   :  { %993 = vmatmul.mubr.f32.gmra.mrb[58].mxu0 %v786_v27  ;;  %v788_v30 = vmax.f32 %v654_v18, 0.0  ;;  %v1773_v27 = vpack.c.bf16 %v1135_v23, %v1134_v21 }
 0x211   :  { %v789_v22 = vmax.f32 %v656_v16, 0.0  ;;  %v659_v29 = vpop.f32.mrb[30].mxu1 }
 0x212   :  { %v660_v31 = vadd.f32 %v659_v29, %v2328_v45  ;;  %v661_v28 = vpop.f32.mrb[31].mxu1  ;;  %1774 = vmatprep.subr.bf16.mxu0 %v1773_v27  ;;  %1784 = vmatprep.subr.bf16.mxu1 %v1773_v27 }
 0x213   :  { %v662_v32 = vadd.f32 %v661_v28, %v2330_v46  ;;  %997 = vmatprep.mubr.f32.mxu0 %v789_v22  ;;  %1776 = vmatpush3.bf16.msra.mxu0 %v1773_v27 }
 0x214   :  { %998 = vmatmul.mubr.f32.gmra.mrb[60].mxu0 %v788_v30  ;;  %v790_v35 = vmax.f32 %v660_v31, 0.0  ;;  %1792 = vmatpush3.bf16.msra.mxu1 %v1773_v27 }
 0x215   :  { %v791_v33 = vmax.f32 %v662_v32, 0.0  ;;  %v665_v34 = vpop.f32.mrb[32].mxu1 }
 0x216   :  { %v666_v36 = vadd.f32 %v665_v34, %v2328_v45  ;;  %v667_v37 = vpop.f32.mrb[33].mxu1 }
 0x217   :  { %v668_v38 = vadd.f32 %v667_v37, %v2330_v46  ;;  %1002 = vmatprep.mubr.f32.mxu0 %v791_v33 }
 0x218   :  { %1003 = vmatmul.mubr.f32.gmra.mrb[62].mxu0 %v790_v35  ;;  %v792_v41 = vmax.f32 %v666_v36, 0.0 }
 0x219   :  { %v793_v39 = vmax.f32 %v668_v38, 0.0  ;;  %v671_v40 = vpop.f32.mrb[34].mxu1 }
 0x21a   :  { %v672_v42 = vadd.f32 %v671_v40, %v2328_v45  ;;  %v673_v43 = vpop.f32.mrb[35].mxu1 }
 0x21b   :  { %v674_v44 = vadd.f32 %v673_v43, %v2330_v46  ;;  %1007 = vmatprep.mubr.f32.mxu0 %v793_v39 }
 0x21c   :  { %1008 = vmatmul.mubr.f32.gmra.mrb[64].mxu0 %v792_v41  ;;  %v794_v49 = vmax.f32 %v672_v42, 0.0 }
 0x21d   :  { %v795_v47 = vmax.f32 %v674_v44, 0.0  ;;  %v677_v48 = vpop.f32.mrb[36].mxu1 }
 0x21e   :  { %v678_v17 = vadd.f32 %v677_v48, %v2328_v45  ;;  %v679_v50 = vpop.f32.mrb[37].mxu1 }
 0x21f   :  { %v680_v51 = vadd.f32 %v679_v50, %v2330_v46  ;;  %1012 = vmatprep.mubr.f32.mxu0 %v795_v47 }
 0x220   :  { %1013 = vmatmul.mubr.f32.gmra.mrb[66].mxu0 %v794_v49  ;;  %v796_v54 = vmax.f32 %v678_v17, 0.0 }
 0x221   :  { %v797_v52 = vmax.f32 %v680_v51, 0.0  ;;  %v683_v53 = vpop.f32.mrb[38].mxu1 }
 0x222   :  { %v684_v55 = vadd.f32 %v683_v53, %v2328_v45  ;;  %v685_v56 = vpop.f32.mrb[39].mxu1 }
 0x223   :  { %v686_v57 = vadd.f32 %v685_v56, %v2330_v46  ;;  %1017 = vmatprep.mubr.f32.mxu0 %v797_v52 }
 0x224   :  { %1018 = vmatmul.mubr.f32.gmra.mrb[68].mxu0 %v796_v54  ;;  %v798_v60 = vmax.f32 %v684_v55, 0.0 }
 0x225   :  { %v799_v58 = vmax.f32 %v686_v57, 0.0  ;;  %v689_v59 = vpop.f32.mrb[40].mxu1 }
 0x226   :  { %v690_v61 = vadd.f32 %v689_v59, %v2328_v45  ;;  %v691_v62 = vpop.f32.mrb[41].mxu1 }
 0x227   :  { %v692_v63 = vadd.f32 %v691_v62, %v2330_v46  ;;  %1022 = vmatprep.mubr.f32.mxu0 %v799_v58 }
 0x228   :  { %1023 = vmatmul.mubr.f32.gmra.mrb[70].mxu0 %v798_v60  ;;  %v800_v3 = vmax.f32 %v690_v61, 0.0 }
 0x229   :  { %v801_v0 = vmax.f32 %v692_v63, 0.0  ;;  %v695_v2 = vpop.f32.mrb[42].mxu1 }
 0x22a   :  { %v696_v4 = vadd.f32 %v695_v2, %v2328_v45  ;;  %v697_v5 = vpop.f32.mrb[43].mxu1 }
 0x22b   :  { %v698_v6 = vadd.f32 %v697_v5, %v2330_v46  ;;  %1027 = vmatprep.mubr.f32.mxu0 %v801_v0 }
 0x22c   :  { %1028 = vmatmul.mubr.f32.gmra.mrb[72].mxu0 %v800_v3  ;;  %v802_v12 = vmax.f32 %v696_v4, 0.0 }
 0x22d   :  { %v803_v7 = vmax.f32 %v698_v6, 0.0  ;;  %v701_v1 = vpop.f32.mrb[44].mxu1 }
 0x22e   :  { %v702_v13 = vadd.f32 %v701_v1, %v2328_v45  ;;  %v703_v14 = vpop.f32.mrb[45].mxu1 }
 0x22f   :  { %v704_v15 = vadd.f32 %v703_v14, %v2330_v46  ;;  %1032 = vmatprep.mubr.f32.mxu0 %v803_v7  ;;  %v2399_v14 = vld [vmem:[%s2491_s6] ss:$0 sm:$0xff] }
 0x230   :  { %1033 = vmatmul.mubr.f32.gmra.mrb[74].mxu0 %v802_v12  ;;  %v804_v24 = vmax.f32 %v702_v13, 0.0 }
 0x231   :  { %v805_v19 = vmax.f32 %v704_v15, 0.0  ;;  %v707_v20 = vpop.f32.mrb[46].mxu1 }
 0x232   :  { %v708_v26 = vadd.f32 %v707_v20, %v2328_v45  ;;  %v709_v8 = vpop.f32.mrb[47].mxu1 }
 0x233   :  { %v710_v18 = vadd.f32 %v709_v8, %v2330_v46  ;;  %1037 = vmatprep.mubr.f32.mxu0 %v805_v19 }
 0x234   :  { %1038 = vmatmul.mubr.f32.gmra.mrb[76].mxu0 %v804_v24  ;;  %v806_v22 = vmax.f32 %v708_v26, 0.0 }
 0x235   :  { %v807_v25 = vmax.f32 %v710_v18, 0.0  ;;  %v713_v16 = vpop.f32.mrb[48].mxu1 }
 0x236   :  { %v714_v29 = vadd.f32 %v713_v16, %v2328_v45  ;;  %v715_v30 = vpop.f32.mrb[49].mxu1 }
 0x237   :  { %v716_v31 = vadd.f32 %v715_v30, %v2330_v46  ;;  %1042 = vmatprep.mubr.f32.mxu0 %v807_v25 }
 0x238   :  { %1043 = vmatmul.mubr.f32.gmra.mrb[78].mxu0 %v806_v22  ;;  %v808_v33 = vmax.f32 %v714_v29, 0.0 }
 0x239   :  { %v809_v28 = vmax.f32 %v716_v31, 0.0  ;;  %v719_v32 = vpop.f32.mrb[50].mxu1 }
 0x23a   :  { %v720_v34 = vadd.f32 %v719_v32, %v2328_v45  ;;  %v721_v35 = vpop.f32.mrb[51].mxu1 }
 0x23b   :  { %v722_v36 = vadd.f32 %v721_v35, %v2330_v46  ;;  %1047 = vmatprep.mubr.f32.mxu0 %v809_v28 }
 0x23c   :  { %1048 = vmatmul.mubr.f32.gmra.mrb[80].mxu0 %v808_v33  ;;  %v810_v39 = vmax.f32 %v720_v34, 0.0 }
 0x23d   :  { %v811_v37 = vmax.f32 %v722_v36, 0.0  ;;  %v725_v38 = vpop.f32.mrb[52].mxu1 }
 0x23e   :  { %v726_v40 = vadd.f32 %v725_v38, %v2328_v45  ;;  %v727_v41 = vpop.f32.mrb[53].mxu1 }
 0x23f   :  { %v728_v42 = vadd.f32 %v727_v41, %v2330_v46  ;;  %1052 = vmatprep.mubr.f32.mxu0 %v811_v37 }
 0x240   :  { %1053 = vmatmul.mubr.f32.gmra.mrb[82].mxu0 %v810_v39  ;;  %v812_v47 = vmax.f32 %v726_v40, 0.0 }
 0x241   :  { %v813_v43 = vmax.f32 %v728_v42, 0.0  ;;  %v731_v44 = vpop.f32.mrb[54].mxu1 }
 0x242   :  { %v732_v48 = vadd.f32 %v731_v44, %v2328_v45  ;;  %v733_v49 = vpop.f32.mrb[55].mxu1 }
 0x243   :  { %v734_v17 = vadd.f32 %v733_v49, %v2330_v46  ;;  %1057 = vmatprep.mubr.f32.mxu0 %v813_v43 }
 0x244   :  { %1058 = vmatmul.mubr.f32.gmra.mrb[84].mxu0 %v812_v47  ;;  %v814_v52 = vmax.f32 %v732_v48, 0.0 }
 0x245   :  { %v815_v50 = vmax.f32 %v734_v17, 0.0  ;;  %v737_v51 = vpop.f32.mrb[56].mxu1 }
 0x246   :  { %v738_v53 = vadd.f32 %v737_v51, %v2328_v45  ;;  %v739_v54 = vpop.f32.mrb[57].mxu1 }
 0x247   :  { %v740_v55 = vadd.f32 %v739_v54, %v2330_v46  ;;  %1062 = vmatprep.mubr.f32.mxu0 %v815_v50 }
 0x248   :  { %1063 = vmatmul.mubr.f32.gmra.mrb[86].mxu0 %v814_v52  ;;  %v816_v58 = vmax.f32 %v738_v53, 0.0 }
 0x249   :  { %v817_v56 = vmax.f32 %v740_v55, 0.0  ;;  %v743_v57 = vpop.f32.mrb[58].mxu1 }
 0x24a   :  { %v744_v59 = vadd.f32 %v743_v57, %v2328_v45  ;;  %v745_v60 = vpop.f32.mrb[59].mxu1 }
 0x24b   :  { %v746_v61 = vadd.f32 %v745_v60, %v2330_v46  ;;  %1067 = vmatprep.mubr.f32.mxu0 %v817_v56 }
 0x24c   :  { %1068 = vmatmul.mubr.f32.gmra.mrb[88].mxu0 %v816_v58  ;;  %v818_v0 = vmax.f32 %v744_v59, 0.0 }
 0x24d   :  { %v819_v62 = vmax.f32 %v746_v61, 0.0  ;;  %v749_v63 = vpop.f32.mrb[60].mxu1 }
 0x24e   :  { %v750_v2 = vadd.f32 %v749_v63, %v2328_v45  ;;  %v751_v3 = vpop.f32.mrb[61].mxu1 }
 0x24f   :  { %v752_v4 = vadd.f32 %v751_v3, %v2330_v46  ;;  %1072 = vmatprep.mubr.f32.mxu0 %v819_v62 }
 0x250   :  { %1073 = vmatmul.mubr.f32.gmra.mrb[90].mxu0 %v818_v0  ;;  %v820_v7 = vmax.f32 %v750_v2, 0.0 }
 0x251   :  { %v821_v5 = vmax.f32 %v752_v4, 0.0  ;;  %v755_v6 = vpop.f32.mrb[62].mxu1 }
 0x252   :  { %v756_v1 = vadd.f32 %v755_v6, %v2328_v45  ;;  %v757_v10 = vpop.f32.mrb[63].mxu1 }
 0x253   :  { %v758_v11 = vadd.f32 %v757_v10, %v2330_v46  ;;  %1077 = vmatprep.mubr.f32.mxu0 %v821_v5 }
 0x254   :  { %1078 = vmatmul.mubr.f32.gmra.mrb[92].mxu0 %v820_v7  ;;  %v822_v13 = vmax.f32 %v756_v1, 0.0 }
 0x255   :  { %v823_v12 = vmax.f32 %v758_v11, 0.0 }
 0x257   :  { %1082 = vmatprep.mubr.f32.mxu0 %v823_v12 }
 0x258   :  { %1083 = vmatmul.mubr.f32.gmra.mrb[94].mxu0 %v822_v13 }
 0x2af   :  { %v929_v9 = vpop.f32.mrb[32].mxu0 }
 0x2b0   :  { %v930_v15 = vadd.f32 %v2399_v14, %v929_v9  ;;  %v931_v19 = vpop.f32.mrb[33].mxu0 }
 0x2b2   :  { %v1088_v20 = vmax.f32 %v930_v15, 0.0 }
 0x2b3   :  { %v934_v45 = vpop.f32.mrb[34].mxu0 }
 0x2b4   :  { %v935_v21 = vadd.f32 %v2399_v14, %v934_v45  ;;  %v936_v46 = vpop.f32.mrb[35].mxu0  ;;  %1617 = vmatprep.mubr.f32.mxu0 %v1088_v20 }
 0x2b6   :  { %v1089_v23 = vmax.f32 %v935_v21, 0.0 }
 0x2b7   :  { %v939_v24 = vpop.f32.mrb[36].mxu0 }
 0x2b8   :  { %v940_v26 = vadd.f32 %v2399_v14, %v939_v24  ;;  %v941_v8 = vpop.f32.mrb[37].mxu0  ;;  %1618 = vmatmul.mubr.f32.vlgmr.msra.gmra.mrb[96].mxu0 %v1089_v23 }
 0x2ba   :  { %v1090_v27 = vmax.f32 %v940_v26, 0.0 }
 0x2bb   :  { %v944_v18 = vpop.f32.mrb[38].mxu0 }
 0x2bc   :  { %v945_v25 = vadd.f32 %v2399_v14, %v944_v18  ;;  %v946_v16 = vpop.f32.mrb[39].mxu0  ;;  %1620 = vmatprep.mubr.f32.mxu0 %v1090_v27 }
 0x2be   :  { %v1091_v22 = vmax.f32 %v945_v25, 0.0 }
 0x2bf   :  { %v949_v29 = vpop.f32.mrb[40].mxu0 }
 0x2c0   :  { %v950_v30 = vadd.f32 %v2399_v14, %v949_v29  ;;  %v951_v31 = vpop.f32.mrb[41].mxu0  ;;  %1621 = vmatmul.mubr.f32.gmra.mrb[98].mxu0 %v1091_v22 }
 0x2c2   :  { %v1092_v28 = vmax.f32 %v950_v30, 0.0 }
 0x2c3   :  { %v954_v32 = vpop.f32.mrb[42].mxu0 }
 0x2c4   :  { %v955_v33 = vadd.f32 %v2399_v14, %v954_v32  ;;  %v956_v34 = vpop.f32.mrb[43].mxu0  ;;  %1623 = vmatprep.mubr.f32.mxu0 %v1092_v28 }
 0x2c6   :  { %v1093_v35 = vmax.f32 %v955_v33, 0.0 }
 0x2c7   :  { %v959_v36 = vpop.f32.mrb[44].mxu0 }
 0x2c8   :  { %v960_v37 = vadd.f32 %v2399_v14, %v959_v36  ;;  %v961_v38 = vpop.f32.mrb[45].mxu0  ;;  %1624 = vmatmul.mubr.f32.gmra.mrb[100].mxu0 %v1093_v35 }
 0x2ca   :  { %v1094_v39 = vmax.f32 %v960_v37, 0.0 }
 0x2cb   :  { %v964_v40 = vpop.f32.mrb[46].mxu0 }
 0x2cc   :  { %v965_v41 = vadd.f32 %v2399_v14, %v964_v40  ;;  %v966_v42 = vpop.f32.mrb[47].mxu0  ;;  %1626 = vmatprep.mubr.f32.mxu1 %v1094_v39 }
 0x2ce   :  { %v1095_v43 = vmax.f32 %v965_v41, 0.0 }
 0x2cf   :  { %v969_v44 = vpop.f32.mrb[48].mxu0 }
 0x2d0   :  { %v970_v47 = vadd.f32 %v2399_v14, %v969_v44  ;;  %v971_v48 = vpop.f32.mrb[49].mxu0  ;;  %1627 = vmatmul.mubr.f32.vlgmr.msra.gmra.mrb[64].mxu1 %v1095_v43 }
 0x2d2   :  { %v1096_v49 = vmax.f32 %v970_v47, 0.0 }
 0x2d3   :  { %v974_v17 = vpop.f32.mrb[50].mxu0 }
 0x2d4   :  { %v975_v50 = vadd.f32 %v2399_v14, %v974_v17  ;;  %v976_v51 = vpop.f32.mrb[51].mxu0  ;;  %1629 = vmatprep.mubr.f32.mxu1 %v1096_v49 }
 0x2d6   :  { %v1097_v52 = vmax.f32 %v975_v50, 0.0 }
 0x2d7   :  { %v979_v53 = vpop.f32.mrb[52].mxu0 }
 0x2d8   :  { %v980_v54 = vadd.f32 %v2399_v14, %v979_v53  ;;  %v981_v55 = vpop.f32.mrb[53].mxu0  ;;  %1630 = vmatmul.mubr.f32.gmra.mrb[66].mxu1 %v1097_v52 }
 0x2da   :  { %v1098_v56 = vmax.f32 %v980_v54, 0.0 }
 0x2db   :  { %v984_v57 = vpop.f32.mrb[54].mxu0 }
 0x2dc   :  { %v985_v58 = vadd.f32 %v2399_v14, %v984_v57  ;;  %v986_v59 = vpop.f32.mrb[55].mxu0  ;;  %1632 = vmatprep.mubr.f32.mxu1 %v1098_v56 }
 0x2de   :  { %v1099_v60 = vmax.f32 %v985_v58, 0.0 }
 0x2df   :  { %v989_v61 = vpop.f32.mrb[56].mxu0 }
 0x2e0   :  { %v990_v62 = vadd.f32 %v2399_v14, %v989_v61  ;;  %v991_v63 = vpop.f32.mrb[57].mxu0  ;;  %1633 = vmatmul.mubr.f32.gmra.mrb[68].mxu1 %v1099_v60 }
 0x2e2   :  { %v1100_v0 = vmax.f32 %v990_v62, 0.0 }
 0x2e3   :  { %v994_v2 = vpop.f32.mrb[58].mxu0 }
 0x2e4   :  { %v995_v3 = vadd.f32 %v2399_v14, %v994_v2  ;;  %v996_v4 = vpop.f32.mrb[59].mxu0  ;;  %1635 = vmatprep.mubr.f32.mxu1 %v1100_v0 }
 0x2e6   :  { %v1101_v5 = vmax.f32 %v995_v3, 0.0 }
 0x2e7   :  { %v999_v6 = vpop.f32.mrb[60].mxu0 }
 0x2e8   :  { %v1000_v7 = vadd.f32 %v2399_v14, %v999_v6  ;;  %v1001_v1 = vpop.f32.mrb[61].mxu0  ;;  %1636 = vmatmul.mubr.f32.gmra.mrb[70].mxu1 %v1101_v5 }
 0x2ea   :  { %v1102_v10 = vmax.f32 %v1000_v7, 0.0 }
 0x2eb   :  { %v1004_v11 = vpop.f32.mrb[62].mxu0 }
 0x2ec   :  { %v1005_v12 = vadd.f32 %v2399_v14, %v1004_v11  ;;  %v1006_v13 = vpop.f32.mrb[63].mxu0  ;;  %1638 = vmatprep.mubr.f32.mxu1 %v1102_v10 }
 0x2ee   :  { %v1103_v9 = vmax.f32 %v1005_v12, 0.0 }
 0x2ef   :  { %v1009_v15 = vpop.f32.mrb[64].mxu0 }
 0x2f0   :  { %v1010_v19 = vadd.f32 %v2399_v14, %v1009_v15  ;;  %v1011_v20 = vpop.f32.mrb[65].mxu0  ;;  %1639 = vmatmul.mubr.f32.gmra.mrb[72].mxu1 %v1103_v9 }
 0x2f2   :  { %v1104_v45 = vmax.f32 %v1010_v19, 0.0  ;;  %v2436_v19 = vld [vmem:[%s2493_s8] ss:$0 sm:$0xff]  ;;  %s1878_s8 = smov [#allocation7]  }
 0x2f3   :  { %v1014_v21 = vpop.f32.mrb[66].mxu0  ;;  %s1405_s14 = sshll.u32 %s1878_s8, 4  ;;  %s1406_s14 = int_to_ptr.vmem [resolvable:$true] %s1405_s14 }
 0x2f4   :  { %v1015_v46 = vadd.f32 %v2399_v14, %v1014_v21  ;;  %v1016_v23 = vpop.f32.mrb[67].mxu0  ;;  %1641 = vmatprep.mubr.f32.mxu1 %v1104_v45  ;;  %s1844_s15 = scalar_lea.vmem %s1406_s14, 4096  ;;  %p1849_p3 = scmp.lt.s32.totalorder %s1406_s14, %s1406_s14 }
 0x2f5   :  { %p1845_p2 = scmp.ne.s32.totalorder %s1406_s14, %s1844_s15  ;;  %p1850_p4 = scmp.lt.s32.totalorder %s1844_s15, %s1844_s15 }
 0x2f6   :  { %v1105_v24 = vmax.f32 %v1015_v46, 0.0 }
 0x2f7   :  { %v1019_v26 = vpop.f32.mrb[68].mxu0  ;;  %p1851_p5 = por %p1850_p4, %p1849_p3 }
 0x2f8   :  { %v1020_v8 = vadd.f32 %v2399_v14, %v1019_v26  ;;  %v1021_v27 = vpop.f32.mrb[69].mxu0  ;;  %1642 = vmatmul.mubr.f32.gmra.mrb[74].mxu1 %v1105_v24 }
 0x2f9   :  { %p1852_p6 = pnand %p1851_p5, %p1845_p2 }
 0x2fa   :  { %v1106_v18 = vmax.f32 %v1020_v8, 0.0 }
 0x2fb   :  { %v1024_v25 = vpop.f32.mrb[70].mxu0 }
 0x2fc   :  { %v1025_v16 = vadd.f32 %v2399_v14, %v1024_v25  ;;  %v1026_v22 = vpop.f32.mrb[71].mxu0  ;;  %1644 = vmatprep.mubr.f32.mxu1 %v1106_v18 }
 0x2fe   :  { %v1107_v29 = vmax.f32 %v1025_v16, 0.0 }
 0x2ff   :  { %v1029_v30 = vpop.f32.mrb[72].mxu0 }
 0x300   :  { %v1030_v31 = vadd.f32 %v2399_v14, %v1029_v30  ;;  %v1031_v28 = vpop.f32.mrb[73].mxu0  ;;  %1645 = vmatmul.mubr.f32.gmra.mrb[76].mxu1 %v1107_v29 }
 0x302   :  { %v1108_v32 = vmax.f32 %v1030_v31, 0.0 }
 0x303   :  { %v1034_v33 = vpop.f32.mrb[74].mxu0 }
 0x304   :  { %v1035_v34 = vadd.f32 %v2399_v14, %v1034_v33  ;;  %v1036_v35 = vpop.f32.mrb[75].mxu0  ;;  %1647 = vmatprep.mubr.f32.mxu1 %v1108_v32 }
 0x306   :  { %v1109_v36 = vmax.f32 %v1035_v34, 0.0 }
 0x307   :  { %v1039_v37 = vpop.f32.mrb[76].mxu0 }
 0x308   :  { %v1040_v38 = vadd.f32 %v2399_v14, %v1039_v37  ;;  %v1041_v39 = vpop.f32.mrb[77].mxu0  ;;  %1648 = vmatmul.mubr.f32.gmra.mrb[78].mxu1 %v1109_v36 }
 0x30a   :  { %v1110_v40 = vmax.f32 %v1040_v38, 0.0 }
 0x30b   :  { %v1044_v41 = vpop.f32.mrb[78].mxu0 }
 0x30c   :  { %v1045_v42 = vadd.f32 %v2399_v14, %v1044_v41  ;;  %v1046_v43 = vpop.f32.mrb[79].mxu0  ;;  %1650 = vmatprep.mubr.f32.mxu1 %v1110_v40 }
 0x30e   :  { %v1111_v44 = vmax.f32 %v1045_v42, 0.0 }
 0x30f   :  { %v1049_v47 = vpop.f32.mrb[80].mxu0 }
 0x310   :  { %v1050_v48 = vadd.f32 %v2399_v14, %v1049_v47  ;;  %v1051_v49 = vpop.f32.mrb[81].mxu0  ;;  %1651 = vmatmul.mubr.f32.gmra.mrb[80].mxu1 %v1111_v44 }
 0x312   :  { %v1112_v17 = vmax.f32 %v1050_v48, 0.0 }
 0x313   :  { %v1054_v50 = vpop.f32.mrb[82].mxu0 }
 0x314   :  { %v1055_v51 = vadd.f32 %v2399_v14, %v1054_v50  ;;  %v1056_v52 = vpop.f32.mrb[83].mxu0  ;;  %1653 = vmatprep.mubr.f32.mxu1 %v1112_v17 }
 0x316   :  { %v1113_v53 = vmax.f32 %v1055_v51, 0.0 }
 0x317   :  { %v1059_v54 = vpop.f32.mrb[84].mxu0 }
 0x318   :  { %v1060_v55 = vadd.f32 %v2399_v14, %v1059_v54  ;;  %v1061_v56 = vpop.f32.mrb[85].mxu0  ;;  %1654 = vmatmul.mubr.f32.gmra.mrb[82].mxu1 %v1113_v53 }
 0x31a   :  { %v1114_v57 = vmax.f32 %v1060_v55, 0.0 }
 0x31b   :  { %v1064_v58 = vpop.f32.mrb[86].mxu0 }
 0x31c   :  { %v1065_v59 = vadd.f32 %v2399_v14, %v1064_v58  ;;  %v1066_v60 = vpop.f32.mrb[87].mxu0  ;;  %1656 = vmatprep.mubr.f32.mxu1 %v1114_v57 }
 0x31e   :  { %v1115_v61 = vmax.f32 %v1065_v59, 0.0 }
 0x31f   :  { %v1069_v62 = vpop.f32.mrb[88].mxu0 }
 0x320   :  { %v1070_v63 = vadd.f32 %v2399_v14, %v1069_v62  ;;  %v1071_v0 = vpop.f32.mrb[89].mxu0  ;;  %1657 = vmatmul.mubr.f32.gmra.mrb[84].mxu1 %v1115_v61 }
 0x322   :  { %v1116_v2 = vmax.f32 %v1070_v63, 0.0 }
 0x323   :  { %v1074_v3 = vpop.f32.mrb[90].mxu0 }
 0x324   :  { %v1075_v4 = vadd.f32 %v2399_v14, %v1074_v3  ;;  %v1076_v5 = vpop.f32.mrb[91].mxu0  ;;  %1659 = vmatprep.mubr.f32.mxu1 %v1116_v2 }
 0x326   :  { %v1117_v6 = vmax.f32 %v1075_v4, 0.0 }
 0x327   :  { %v1079_v7 = vpop.f32.mrb[92].mxu0 }
 0x328   :  { %v1080_v1 = vadd.f32 %v2399_v14, %v1079_v7  ;;  %v1081_v10 = vpop.f32.mrb[93].mxu0  ;;  %1660 = vmatmul.mubr.f32.gmra.mrb[86].mxu1 %v1117_v6 }
 0x32a   :  { %v1118_v11 = vmax.f32 %v1080_v1, 0.0 }
 0x32b   :  { %v1084_v12 = vpop.f32.mrb[94].mxu0 }
 0x32c   :  { %v1085_v13 = vadd.f32 %v2399_v14, %v1084_v12  ;;  %v1086_v9 = vpop.f32.mrb[95].mxu0  ;;  %1662 = vmatprep.mubr.f32.mxu1 %v1118_v11 }
 0x32e   :  { %v1119_v15 = vmax.f32 %v1085_v13, 0.0 }
 0x330   :  { %1663 = vmatmul.mubr.f32.gmra.mrb[88].mxu1 %v1119_v15 }
 0x38b   :  { %v1619_v20 = vpop.f32.mrb[96].mxu0 }
 0x38c   :  { %v1215_v45 = vadd.f32 %v1619_v20, %v2436_v19  ;;  %v1209_v21 = vpop.f32.mrb[97].mxu0 }
 0x38d   :  { %v1210_v46 = vadd.f32 %v2436_v19, %v1209_v21 }
 0x38e   :  { %1369 = vst [vmem:[#allocation7 + $0x8] sm:$0xff] %v1215_v45 }
 0x38f   :  { %1368 = vst [vmem:[#allocation7] sm:$0xff] %v1210_v46 }
 0x393   :  { %v1622_v23 = vpop.f32.mrb[98].mxu0 }
 0x394   :  { %v1225_v14 = vadd.f32 %v1622_v23, %v2436_v19  ;;  %v1219_v24 = vpop.f32.mrb[99].mxu0 }
 0x395   :  { %v1220_v26 = vadd.f32 %v2436_v19, %v1219_v24 }
 0x396   :  { %1371 = vst [vmem:[#allocation7 + $0x18] sm:$0xff] %v1225_v14 }
 0x397   :  { %1370 = vst [vmem:[#allocation7 + $0x10] sm:$0xff] %v1220_v26 }
 0x39b   :  { %v1625_v8 = vpop.f32.mrb[100].mxu0 }
 0x39c   :  { %v1235_v27 = vadd.f32 %v1625_v8, %v2436_v19  ;;  %v1229_v18 = vpop.f32.mrb[101].mxu0 }
 0x39d   :  { %v1230_v25 = vadd.f32 %v2436_v19, %v1229_v18 }
 0x39e   :  { %1373 = vst [vmem:[#allocation7 + $0x28] sm:$0xff] %v1235_v27 }
 0x39f   :  { %1372 = vst [vmem:[#allocation7 + $0x20] sm:$0xff] %v1230_v25 }
 0x3a3   :  { %v1628_v16 = vpop.f32.mrb[64].mxu1 }
 0x3a4   :  { %v1245_v22 = vadd.f32 %v1628_v16, %v2436_v19  ;;  %v1239_v29 = vpop.f32.mrb[65].mxu1 }
 0x3a5   :  { %v1240_v30 = vadd.f32 %v2436_v19, %v1239_v29 }
 0x3a6   :  { %1375 = vst [vmem:[#allocation7 + $0x38] sm:$0xff] %v1245_v22 }
 0x3a7   :  { %1374 = vst [vmem:[#allocation7 + $0x30] sm:$0xff] %v1240_v30 }
 0x3ab   :  { %v1631_v31 = vpop.f32.mrb[66].mxu1 }
 0x3ac   :  { %v1255_v28 = vadd.f32 %v1631_v31, %v2436_v19  ;;  %v1249_v32 = vpop.f32.mrb[67].mxu1 }
 0x3ad   :  { %v1250_v33 = vadd.f32 %v2436_v19, %v1249_v32 }
 0x3ae   :  { %1377 = vst [vmem:[#allocation7 + $0x48] sm:$0xff] %v1255_v28 }
 0x3af   :  { %1376 = vst [vmem:[#allocation7 + $0x40] sm:$0xff] %v1250_v33 }
 0x3b3   :  { %v1634_v34 = vpop.f32.mrb[68].mxu1 }
 0x3b4   :  { %v1265_v35 = vadd.f32 %v1634_v34, %v2436_v19  ;;  %v1259_v36 = vpop.f32.mrb[69].mxu1 }
 0x3b5   :  { %v1260_v37 = vadd.f32 %v2436_v19, %v1259_v36 }
 0x3b6   :  { %1379 = vst [vmem:[#allocation7 + $0x58] sm:$0xff] %v1265_v35 }
 0x3b7   :  { %1378 = vst [vmem:[#allocation7 + $0x50] sm:$0xff] %v1260_v37 }
 0x3bb   :  { %v1637_v38 = vpop.f32.mrb[70].mxu1 }
 0x3bc   :  { %v1275_v39 = vadd.f32 %v1637_v38, %v2436_v19  ;;  %v1269_v40 = vpop.f32.mrb[71].mxu1 }
 0x3bd   :  { %v1270_v41 = vadd.f32 %v2436_v19, %v1269_v40 }
 0x3be   :  { %1381 = vst [vmem:[#allocation7 + $0x68] sm:$0xff] %v1275_v39 }
 0x3bf   :  { %1380 = vst [vmem:[#allocation7 + $0x60] sm:$0xff] %v1270_v41 }
 0x3c3   :  { %v1640_v42 = vpop.f32.mrb[72].mxu1 }
 0x3c4   :  { %v1285_v43 = vadd.f32 %v1640_v42, %v2436_v19  ;;  %v1279_v44 = vpop.f32.mrb[73].mxu1 }
 0x3c5   :  { %v1280_v47 = vadd.f32 %v2436_v19, %v1279_v44 }
 0x3c6   :  { %1383 = vst [vmem:[#allocation7 + $0x78] sm:$0xff] %v1285_v43 }
 0x3c7   :  { %1382 = vst [vmem:[#allocation7 + $0x70] sm:$0xff] %v1280_v47 }
 0x3cb   :  { %v1643_v48 = vpop.f32.mrb[74].mxu1 }
 0x3cc   :  { %v1295_v49 = vadd.f32 %v1643_v48, %v2436_v19  ;;  %v1289_v17 = vpop.f32.mrb[75].mxu1 }
 0x3cd   :  { %v1290_v50 = vadd.f32 %v2436_v19, %v1289_v17 }
 0x3ce   :  { %1385 = vst [vmem:[#allocation7 + $0x88] sm:$0xff] %v1295_v49 }
 0x3cf   :  { %1384 = vst [vmem:[#allocation7 + $0x80] sm:$0xff] %v1290_v50 }
 0x3d3   :  { %v1646_v51 = vpop.f32.mrb[76].mxu1 }
 0x3d4   :  { %v1305_v52 = vadd.f32 %v1646_v51, %v2436_v19  ;;  %v1299_v53 = vpop.f32.mrb[77].mxu1 }
 0x3d5   :  { %v1300_v54 = vadd.f32 %v2436_v19, %v1299_v53 }
 0x3d6   :  { %1387 = vst [vmem:[#allocation7 + $0x98] sm:$0xff] %v1305_v52 }
 0x3d7   :  { %1386 = vst [vmem:[#allocation7 + $0x90] sm:$0xff] %v1300_v54 }
 0x3db   :  { %v1649_v55 = vpop.f32.mrb[78].mxu1 }
 0x3dc   :  { %v1315_v56 = vadd.f32 %v1649_v55, %v2436_v19  ;;  %v1309_v57 = vpop.f32.mrb[79].mxu1 }
 0x3dd   :  { %v1310_v58 = vadd.f32 %v2436_v19, %v1309_v57 }
 0x3de   :  { %1389 = vst [vmem:[#allocation7 + $0xa8] sm:$0xff] %v1315_v56 }
 0x3df   :  { %1388 = vst [vmem:[#allocation7 + $0xa0] sm:$0xff] %v1310_v58 }
 0x3e3   :  { %v1652_v59 = vpop.f32.mrb[80].mxu1 }
 0x3e4   :  { %v1325_v60 = vadd.f32 %v1652_v59, %v2436_v19  ;;  %v1319_v61 = vpop.f32.mrb[81].mxu1 }
 0x3e5   :  { %v1320_v62 = vadd.f32 %v2436_v19, %v1319_v61 }
 0x3e6   :  { %1391 = vst [vmem:[#allocation7 + $0xb8] sm:$0xff] %v1325_v60 }
 0x3e7   :  { %1390 = vst [vmem:[#allocation7 + $0xb0] sm:$0xff] %v1320_v62 }
 0x3eb   :  { %v1655_v63 = vpop.f32.mrb[82].mxu1 }
 0x3ec   :  { %v1335_v0 = vadd.f32 %v1655_v63, %v2436_v19  ;;  %v1329_v2 = vpop.f32.mrb[83].mxu1 }
 0x3ed   :  { %v1330_v3 = vadd.f32 %v2436_v19, %v1329_v2 }
 0x3ee   :  { %1393 = vst [vmem:[#allocation7 + $0xc8] sm:$0xff] %v1335_v0 }
 0x3ef   :  { %1392 = vst [vmem:[#allocation7 + $0xc0] sm:$0xff] %v1330_v3 }
 0x3f3   :  { %v1658_v4 = vpop.f32.mrb[84].mxu1 }
 0x3f4   :  { %v1345_v5 = vadd.f32 %v1658_v4, %v2436_v19  ;;  %v1339_v6 = vpop.f32.mrb[85].mxu1 }
 0x3f5   :  { %v1340_v7 = vadd.f32 %v2436_v19, %v1339_v6 }
 0x3f6   :  { %1395 = vst [vmem:[#allocation7 + $0xd8] sm:$0xff] %v1345_v5 }
 0x3f7   :  { %1394 = vst [vmem:[#allocation7 + $0xd0] sm:$0xff] %v1340_v7 }
 0x3fb   :  { %v1661_v1 = vpop.f32.mrb[86].mxu1 }
 0x3fc   :  { %v1355_v10 = vadd.f32 %v1661_v1, %v2436_v19  ;;  %v1349_v11 = vpop.f32.mrb[87].mxu1 }
 0x3fd   :  { %v1350_v12 = vadd.f32 %v2436_v19, %v1349_v11 }
 0x3fe   :  { %1397 = vst [vmem:[#allocation7 + $0xe8] sm:$0xff] %v1355_v10 }
 0x3ff   :  { %1396 = vst [vmem:[#allocation7 + $0xe0] sm:$0xff] %v1350_v12 }
 0x403   :  { %v1664_v13 = vpop.f32.mrb[88].mxu1 }
 0x404   :  { %v1365_v9 = vadd.f32 %v1664_v13, %v2436_v19  ;;  %v1359_v15 = vpop.f32.mrb[89].mxu1 }
 0x405   :  { %v1360_v20 = vadd.f32 %v2436_v19, %v1359_v15 }
 0x406   :  { %1399 = vst [vmem:[#allocation7 + $0xf8] sm:$0xff] %v1365_v9 }
 0x407   :  { %1398 = vst [vmem:[#allocation7 + $0xf0] sm:$0xff] %v1360_v20 }
 0x408   :  { %1855 = shalt.err (!%p1852_p6)
}
 0x409   :  { %s1856_s18 = scalar_lea.hbm %s2494_s9, 4096 }
 0x40a   :  { %p1857_p7 = scmp.ne.s32.totalorder %s2494_s9, %s1856_s18  ;;  %p1860_p8 = scmp.lt.u32.totalorder %s1856_s18, %s2494_s9 }
 0x40c   :  { %p1862_p9 = pnand %p1860_p8, %p1857_p7 }
 0x40e   :  { %1865 = shalt.err (!%p1862_p9)
}
 0x40f   :  { %1411 = dma.vmem_to_hbm [thread:$0]  %s1406_s14, 4096, %s2494_s9, [#allocation4], %s1873_s19, %s1873_s19, %s1874_s20  }
 0x410   :  { %1870 = dma.done.wait [#allocation4], 4096  }
 0x411   :  { %1871 = vsyncadd [#allocation4], 4294963200 }
 0x412   :  { %1415 = vsyncpa [#allocation3], 1 }
 0x413   :  { %1416 = vsyncpa [#allocation6], 1 }
 0x414   :  { %1417 = vsyncpa [#allocation4], 1 }

</bundles_post_ra>
